<compile_context>
chip_gen: v7x
topology: tpu7x:2x2x1
jax: 0.10.0
libtpu: 0.0.40
codegen_flags: <defaults>
</compile_context>

<pallas_src>
import functools

import numpy as np
import jax
import jax.numpy as jnp
from jax.experimental import pallas as pl
from jax.experimental.pallas import tpu as pltpu


BN_EPS = 1e-5
ACT_DTYPE = jnp.bfloat16          # HBM dtype for activations & weights (f32 accumulate)

# Generation-aware scoped-VMEM limit: 64 MiB on v5e/v6e, 32 MiB on v7x.
try:
    _VMEM_CAP = int(pltpu.get_tpu_info().vmem_capacity_bytes)
except Exception:                                    # query unavailable -> safe default
    _VMEM_CAP = 64 * 1024 * 1024
_VMEM_LIMIT = int(min(64 * 1024 * 1024, max(_VMEM_CAP // 2, 16 * 1024 * 1024)))


def _round_up(x, m):
    return (x + m - 1) // m * m


def _act(h, kind):
    if kind == "relu":
        return jnp.maximum(h, 0.0)
    return h


# --------------------------------------------------------------------------
# Glue ops: avg-pool 2x2 and PyTorch-style bilinear (align_corners=False)
# --------------------------------------------------------------------------
def avg_pool_2x2(x):
    B, H, W, C = x.shape
    Ho, Wo = H // 2, W // 2
    return x[:, :2 * Ho, :2 * Wo, :].reshape(B, Ho, 2, Wo, 2, C).mean(axis=(2, 4))


def _lin_coords(out_size, in_size):
    scale = in_size / out_size
    src = (np.arange(out_size) + 0.5) * scale - 0.5
    src = np.clip(src, 0.0, in_size - 1)
    lo = np.floor(src).astype(np.int32)
    hi = np.minimum(lo + 1, in_size - 1).astype(np.int32)
    frac = (src - lo).astype(np.float32)
    return lo, hi, frac


def bilinear_resize(x, ho, wo):
    b, h, w, c = x.shape
    if (h, w) == (ho, wo):
        return x
    rlo, rhi, rf = _lin_coords(ho, h)
    clo, chi, cf = _lin_coords(wo, w)
    rf = rf[None, :, None, None]
    cf = cf[None, None, :, None]
    rows = x[:, rlo] * (1.0 - rf) + x[:, rhi] * rf
    out = rows[:, :, clo] * (1.0 - cf) + rows[:, :, chi] * cf
    return out.astype(x.dtype)


# --------------------------------------------------------------------------
# Kernel 1: direct 3x3 conv (stride 1, pad 1) fused with BN/ReLU + 1x1 stage.
# One pallas_call per Conv2dBlock; grid over batch only.
# --------------------------------------------------------------------------
def _conv3x3_block_kernel(Wp, m, act1, act2):
    """x_ref : (1, Hp*Wp, C)  zero-padded rows, flattened as h*Wp + w   (bf16)
       w1_ref: (9, C, N1)     3x3 taps, BN scale folded in              (bf16)
       b1_ref: (1, N1)  f32
       w2_ref: (N1, N2)       1x1 second stage, BN scale folded in      (bf16)
       b2_ref: (1, N2)  f32
       o_ref : (1, m, N2)     m = H*Wp rows; columns w >= W are junk."""

    def kernel(x_ref, w1_ref, b1_ref, w2_ref, b2_ref, o_ref):
        xb = x_ref.at[0]                                   # (Hp*Wp, C) ref view
        acc = None
        for t in range(9):
            ki, kj = divmod(t, 3)
            s = ki * Wp + kj                               # static row offset
            xs = xb[s:s + m, :]                            # (m, C) contiguous slab
            d = jnp.dot(xs, w1_ref[t], preferred_element_type=jnp.float32)
            acc = d if acc is None else acc + d
        h = _act(acc + b1_ref[...], act1)                  # f32 epilogue
        h = jnp.dot(h.astype(w2_ref.dtype), w2_ref[...],
                    preferred_element_type=jnp.float32)
        h = _act(h + b2_ref[...], act2)
        o_ref[0] = h.astype(o_ref.dtype)

    return kernel


@functools.partial(jax.jit,
                   static_argnames=("act1", "act2", "pre_pool", "resize_pre_add"))
def _convblock_call(x, pre_add, w1, b1, w2, b2, *,
                    act1="relu", act2="relu",
                    pre_pool=False, resize_pre_add=False):
    """Full Conv2dBlock (3x3 -> BN -> ReLU -> 1x1 -> BN -> ReLU) as one pallas_call.

    Optional avg-pool of the input and bilinear-resized skip add are fused into
    this jitted producer so they never cost a standalone HBM round trip.
    """
    if pre_pool:
        x = avg_pool_2x2(x)
    if pre_add is not None:
        pa = pre_add
        if resize_pre_add:
            pa = bilinear_resize(pa, x.shape[1], x.shape[2])
        x = x + pa
    x = x.astype(ACT_DTYPE)

    B, H, W, C = x.shape
    Wp = W + 2                       # one halo column each side
    Hp = H + 3                       # halo rows + one spare zero row so the (2,2)
                                     # tap's contiguous slab stays in bounds
    m = H * Wp                       # output rows per image (incl. 2 junk cols/row)
    xp = jnp.pad(x, ((0, 0), (1, 2), (1, 1), (0, 0))).reshape(B, Hp * Wp, C)

    N1, N2 = w1.shape[-1], w2.shape[-1]
    y = pl.pallas_call(
        _conv3x3_block_kernel(Wp, m, act1, act2),
        out_shape=jax.ShapeDtypeStruct((B, m, N2), ACT_DTYPE),
        grid_spec=pltpu.PrefetchScalarGridSpec(
            num_scalar_prefetch=0,
            grid=(B,),
            in_specs=[pl.BlockSpec((1, Hp * Wp, C), lambda b: (b, 0, 0)),
                      pl.BlockSpec((9, C, N1), lambda b: (0, 0, 0)),
                      pl.BlockSpec((1, N1), lambda b: (0, 0)),
                      pl.BlockSpec((N1, N2), lambda b: (0, 0)),
                      pl.BlockSpec((1, N2), lambda b: (0, 0))],
            out_specs=pl.BlockSpec((1, m, N2), lambda b: (b, 0, 0))),
        compiler_params=pltpu.CompilerParams(
            dimension_semantics=("parallel",),
            vmem_limit_bytes=_VMEM_LIMIT),
    )(xp, w1, b1, w2, b2)
    # Drop the 2 junk columns per output row.
    return y.reshape(B, H, Wp, N2)[:, :, :W, :]


# --------------------------------------------------------------------------
# Kernel 2: single-step matmul conv (1x1 convs + tiny strided PEM 3x3 convs).
# --------------------------------------------------------------------------
def _matmul_kernel(act, has_res):
    def kernel(*refs):
        if has_res:
            x_ref, w_ref, b_ref, r_ref, o_ref = refs
        else:
            x_ref, w_ref, b_ref, o_ref = refs
            r_ref = None
        h = jnp.dot(x_ref[...], w_ref[...], preferred_element_type=jnp.float32)
        h = _act(h + b_ref[...], act)
        if has_res:
            h = h + r_ref[...].astype(jnp.float32)
        o_ref[...] = h.astype(o_ref.dtype)

    return kernel


def _matmul_conv(x2d, w, b, res2d, act):
    """out = act(x2d @ w + b) [+ res2d].  Full-K, full-M single block (K <= 576)."""
    M, K = x2d.shape
    N = w.shape[1]
    has_res = res2d is not None

    if M <= 1024:
        tm = _round_up(M, 16)                 # single full-M block (full-dim exception)
        Mp, mgrid = tm, 1
    else:                                      # not hit at these shapes; keeps it general
        tm = 512
        Mp = _round_up(M, tm)
        mgrid = Mp // tm

    xp = x2d if Mp == M else jnp.pad(x2d, ((0, Mp - M), (0, 0)))
    rp = None
    if has_res:
        rp = res2d if Mp == M else jnp.pad(res2d, ((0, Mp - M), (0, 0)))

    in_specs = [pl.BlockSpec((tm, K), lambda i: (i, 0)),
                pl.BlockSpec((K, N), lambda i: (0, 0)),
                pl.BlockSpec((1, N), lambda i: (0, 0))]
    args = [xp, w, b]
    if has_res:
        in_specs.append(pl.BlockSpec((tm, N), lambda i: (i, 0)))
        args.append(rp)

    out = pl.pallas_call(
        _matmul_kernel(act, has_res),
        out_shape=jax.ShapeDtypeStruct((Mp, N), ACT_DTYPE),
        grid_spec=pltpu.PrefetchScalarGridSpec(
            num_scalar_prefetch=0,
            grid=(mgrid,),
            in_specs=in_specs,
            out_specs=pl.BlockSpec((tm, N), lambda i: (i, 0))),
        compiler_params=pltpu.CompilerParams(
            dimension_semantics=("parallel",),
            vmem_limit_bytes=_VMEM_LIMIT),
    )(*args)
    return out if Mp == M else out[:M]


@functools.partial(jax.jit,
                   static_argnames=("kh", "kw", "stride", "pad", "act"))
def _conv_call(x, pre_add, residual, w, b, *, kh, kw, stride, pad, act):
    """1x1 convs and the tiny strided PEM 3x3 convs (via im2col) + fused epilogue."""
    if pre_add is not None:
        x = x + pre_add
    x = x.astype(ACT_DTYPE)
    B, H, W, C = x.shape
    if kh == 1 and kw == 1 and stride == 1 and pad == 0:
        Ho, Wo = H, W
        cols = x.reshape(B * H * W, C)           # free: NHWC is already pixel-major
    else:
        xpad = jnp.pad(x, ((0, 0), (pad, pad), (pad, pad), (0, 0)))
        Ho = (H + 2 * pad - kh) // stride + 1
        Wo = (W + 2 * pad - kw) // stride + 1
        slabs = [xpad[:, i:i + stride * (Ho - 1) + 1:stride,
                         j:j + stride * (Wo - 1) + 1:stride, :]
                 for i in range(kh) for j in range(kw)]
        cols = jnp.concatenate(slabs, axis=-1).reshape(B * Ho * Wo, kh * kw * C)
    res2d = None
    if residual is not None:
        res2d = residual.astype(ACT_DTYPE).reshape(B * Ho * Wo, residual.shape[-1])
    y = _matmul_conv(cols, w, b, res2d, act)
    return y.reshape(B, Ho, Wo, w.shape[1])


# --------------------------------------------------------------------------
# Deterministic parameter init (Kaiming fan_in, zero bias, folded eval BN)
# --------------------------------------------------------------------------
class KeyGen:
    def __init__(self, key):
        self._key = key

    def __call__(self):
        self._key, sub = jax.random.split(self._key)
        return sub


def _kaiming(kg, shape, fan_in):
    return jax.random.normal(kg(), shape, jnp.float32) * np.sqrt(2.0 / fan_in)


def init_conv(kg, kh, kw, cin, cout, bn=True):
    """Generic conv as a (K, N) matmul weight; BN scale (eval, fresh stats) folded."""
    fan_in = kh * kw * cin
    w = _kaiming(kg, (fan_in, cout), fan_in)
    if bn:
        w = w / np.sqrt(1.0 + BN_EPS)
    return {"w": w.astype(ACT_DTYPE),
            "b": jnp.zeros((1, cout), jnp.float32),
            "kh": kh, "kw": kw}


def init_block1x1(kg, cin, cout):
    return init_conv(kg, 1, 1, cin, cout, bn=True)


def init_convblock(kg, cin, cout):
    w1 = _kaiming(kg, (9, cin, cout), 9 * cin) / np.sqrt(1.0 + BN_EPS)
    w2 = _kaiming(kg, (cout, cout), cout) / np.sqrt(1.0 + BN_EPS)
    return {"w1": w1.astype(ACT_DTYPE), "b1": jnp.zeros((1, cout), jnp.float32),
            "w2": w2.astype(ACT_DTYPE), "b2": jnp.zeros((1, cout), jnp.float32)}


# --------------------------------------------------------------------------
# Module applications
# --------------------------------------------------------------------------
def apply_conv(p, x, *, stride=1, pad=0, act="none", pre_add=None):
    return _conv_call(x, pre_add, None, p["w"], p["b"],
                      kh=p["kh"], kw=p["kw"], stride=stride, pad=pad, act=act)


def apply_block1x1(p, x, *, pre_add=None, residual=None):
    """Conv2dBlock1x1: relu(bn(conv1x1(x)))  [+ residual fused in the epilogue]."""
    return _conv_call(x, pre_add, residual, p["w"], p["b"],
                      kh=1, kw=1, stride=1, pad=0, act="relu")


def apply_convblock(p, x, *, pre_add=None, pre_pool=False, resize_pre_add=False):
    """Conv2dBlock: relu(bn(conv1x1(relu(bn(conv3x3(x)))))) -- one pallas_call."""
    return _convblock_call(x, pre_add, p["w1"], p["b1"], p["w2"], p["b2"],
                           act1="relu", act2="relu",
                           pre_pool=pre_pool, resize_pre_add=resize_pre_add)


def init_unet(kg, num, channel):
    return {"enc": [init_convblock(kg, channel, channel) for _ in range(num)],
            "dec": [init_convblock(kg, channel, channel) for _ in range(num)]}


def apply_unet(p, x):
    num = len(p["enc"])
    skips = []
    t = x
    for idx, cp in enumerate(p["enc"]):
        skips.append(t)
        t = apply_convblock(cp, t, pre_pool=(idx != num - 1))     # pool fused in jit
    for idx, cp in enumerate(p["dec"]):
        tgt = skips[num - 1 - idx]
        t = apply_convblock(cp, tgt, pre_add=t, resize_pre_add=True)  # resize+add fused
    return t


def init_mum(kg, in_ch, out_ch):
    return {"conv_b": init_block1x1(kg, in_ch, in_ch),
            "conv_c": init_block1x1(kg, in_ch, in_ch),
            "conv_e": init_convblock(kg, in_ch, out_ch),
            "unets": [init_unet(kg, i + 1, in_ch // 4) for i in range(4)]}


def apply_mum(p, x):
    xout = apply_block1x1(p["conv_b"], x)
    c = x.shape[-1] // 4
    parts = [xout[..., i * c:(i + 1) * c] for i in range(4)]
    for i, up in enumerate(p["unets"]):
        parts[i] = apply_unet(up, parts[i])
        if i != 3:
            parts[i + 1] = parts[i + 1] + parts[i]
    cat = jnp.concatenate(parts, axis=-1)
    pre_e = apply_block1x1(p["conv_c"], cat, residual=x)   # "+ x" fused in kernel
    return apply_convblock(p["conv_e"], pre_e)


def init_pem(kg):
    return {"conv0": init_conv(kg, 1, 1, 128, 64, bn=False),
            "conv1": init_conv(kg, 3, 3, 64, 64, bn=False),
            "conv2": init_conv(kg, 3, 3, 64, 64, bn=False),
            "conv3": init_conv(kg, 3, 3, 64, 64, bn=False),
            "mix": init_conv(kg, 1, 1, 4 * 64, 128, bn=False),
            "mix_": init_conv(kg, 1, 1, 2 * 128, 64, bn=False)}


def apply_pem(p, x):
    H, W = x.shape[1], x.shape[2]
    out0 = apply_conv(p["conv0"], x)
    out1 = bilinear_resize(apply_conv(p["conv1"], out0, stride=2, pad=0), H, W)
    out2 = bilinear_resize(apply_conv(p["conv2"], out0, stride=4, pad=0,
                                      pre_add=out1), H, W)       # conv2(out0 + out1)
    out3 = bilinear_resize(apply_conv(p["conv3"], out0, stride=6, pad=0,
                                      pre_add=out2), H, W)       # conv3(out0 + out2)
    mixed = apply_conv(p["mix"], jnp.concatenate([out0, out1, out2, out3], axis=-1))
    return apply_conv(p["mix_"], jnp.concatenate([x, mixed], axis=-1))


def init_compress(kg):
    return {"c1": init_convblock(kg, 64, 64), "c2": init_convblock(kg, 256, 64),
            "c3": init_convblock(kg, 512, 64), "c4": init_convblock(kg, 1024, 64),
            "c5": init_convblock(kg, 2048, 128),
            "m0": init_mum(kg, 64, 64), "m1": init_mum(kg, 64, 64),
            "m2": init_mum(kg, 64, 64), "m3": init_mum(kg, 64, 64),
            "m4": init_mum(kg, 128, 64), "pem": init_pem(kg)}


def apply_compress(p, o1, o2, o3, o4, o5):
    o1 = apply_mum(p["m0"], apply_convblock(p["c1"], o1))
    o2 = apply_mum(p["m1"], apply_convblock(p["c2"], o2))
    o3 = apply_mum(p["m2"], apply_convblock(p["c3"], o3))
    o4 = apply_mum(p["m3"], apply_convblock(p["c4"], o4))
    temp = apply_convblock(p["c5"], o5)
    o5_1 = apply_mum(p["m4"], temp)
    o5_2 = apply_pem(p["pem"], temp)
    return o1, o2, o3, o4, o5_1, o5_2


# --------------------------------------------------------------------------
if __name__ == "__main__":
    kg = KeyGen(jax.random.PRNGKey(42))
    params = init_compress(kg)

    # Small ResNet-50-like feature pyramid (NCHW shapes as in the PyTorch spec),
    # transposed to NHWC.  Spatial >= 8 keeps the deepest InbuiltUNet (3x AvgPool
    # 2x2) and PEM's stride-6 valid conv well-defined.
    ks = jax.random.split(jax.random.PRNGKey(0), 5)
    shapes_nchw = [(1, 64, 16, 16), (1, 256, 16, 16), (1, 512, 8, 8),
                   (1, 1024, 8, 8), (1, 2048, 8, 8)]
    feats = [jnp.transpose(jax.random.normal(k, s, jnp.float32),
                           (0, 2, 3, 1)).astype(ACT_DTYPE)
             for k, s in zip(ks, shapes_nchw)]

    outs = apply_compress(params, *feats)
    outs = jax.block_until_ready(outs)

    expected = [(1, 16, 16, 64), (1, 16, 16, 64), (1, 8, 8, 64),
                (1, 8, 8, 64), (1, 8, 8, 64), (1, 8, 8, 64)]
    assert len(outs) == 6
    for o, es in zip(outs, expected):
        assert o.shape == es, (o.shape, es)
        assert bool(jnp.isfinite(o.astype(jnp.float32)).all())
    print("KERNEL_OK")
</pallas_src>

<mosaic_0001>
module attributes {stable_mosaic.version = 11 : i64} {
  func.func @kernel(%arg0: i32, %arg1: memref<1x342x64xbf16, #tpu.memory_space<vmem>>, %arg2: memref<9x64x64xbf16, #tpu.memory_space<vmem>>, %arg3: memref<1x64xf32, #tpu.memory_space<vmem>>, %arg4: memref<64x64xbf16, #tpu.memory_space<vmem>>, %arg5: memref<1x64xf32, #tpu.memory_space<vmem>>, %arg6: memref<1x288x64xbf16, #tpu.memory_space<vmem>>) attributes {dimension_semantics = [#tpu.dimension_semantics<parallel>], iteration_bounds = array<i64: 1>, scalar_prefetch = 0 : i64, scratch_operands = 0 : i64, tpu.core_type = #tpu.core_type<tc>, window_params = [{transform_indices = @transform_0, window_bounds = array<i64: 1, 342, 64>}, {pipeline_mode = #tpu.pipeline_mode<synchronous>, transform_indices = @transform_1, window_bounds = array<i64: 9, 64, 64>}, {pipeline_mode = #tpu.pipeline_mode<synchronous>, transform_indices = @transform_2, window_bounds = array<i64: 1, 64>}, {pipeline_mode = #tpu.pipeline_mode<synchronous>, transform_indices = @transform_3, window_bounds = array<i64: 64, 64>}, {pipeline_mode = #tpu.pipeline_mode<synchronous>, transform_indices = @transform_4, window_bounds = array<i64: 1, 64>}, {transform_indices = @transform_5, window_bounds = array<i64: 1, 288, 64>}]} {
    %c0_i32 = arith.constant 0 : i32
    %c0_i32_0 = arith.constant 0 : i32
    %c0_i32_1 = arith.constant 0 : i32
    %0 = tpu.memref_slice %arg1[%c0_i32, %c0_i32_0, %c0_i32_1] : memref<1x342x64xbf16, #tpu.memory_space<vmem>> -> memref<1x342x64xbf16, #tpu.memory_space<vmem>>
    %1 = tpu.memref_squeeze %0 : memref<1x342x64xbf16, #tpu.memory_space<vmem>> -> memref<342x64xbf16, #tpu.memory_space<vmem>>
    %c0 = arith.constant 0 : index
    %c0_2 = arith.constant 0 : index
    %2 = vector.load %1[%c0, %c0_2] : memref<342x64xbf16, #tpu.memory_space<vmem>>, vector<288x64xbf16>
    %c0_3 = arith.constant 0 : index
    %c0_4 = arith.constant 0 : index
    %c0_5 = arith.constant 0 : index
    %3 = vector.load %arg2[%c0_3, %c0_4, %c0_5] : memref<9x64x64xbf16, #tpu.memory_space<vmem>>, vector<1x64x64xbf16>
    %4 = vector.shape_cast %3 : vector<1x64x64xbf16> to vector<64x64xbf16>
    %cst = arith.constant dense<0.000000e+00> : vector<288x64xf32>
    %5 = tpu.matmul %2, %4, %cst {dimension_numbers = #tpu.dot_dimension_numbers<[1], [0], [0], [1], [0, 0, 1, 1], [], []>} : vector<288x64xbf16>, vector<64x64xbf16>, vector<288x64xf32> -> vector<288x64xf32>
    %c0_i32_6 = arith.constant 0 : i32
    %c0_i32_7 = arith.constant 0 : i32
    %c0_i32_8 = arith.constant 0 : i32
    %6 = tpu.memref_slice %arg1[%c0_i32_6, %c0_i32_7, %c0_i32_8] : memref<1x342x64xbf16, #tpu.memory_space<vmem>> -> memref<1x342x64xbf16, #tpu.memory_space<vmem>>
    %7 = tpu.memref_squeeze %6 : memref<1x342x64xbf16, #tpu.memory_space<vmem>> -> memref<342x64xbf16, #tpu.memory_space<vmem>>
    %c1 = arith.constant 1 : index
    %c0_9 = arith.constant 0 : index
    %8 = vector.load %7[%c1, %c0_9] : memref<342x64xbf16, #tpu.memory_space<vmem>>, vector<288x64xbf16>
    %c1_10 = arith.constant 1 : index
    %c0_11 = arith.constant 0 : index
    %c0_12 = arith.constant 0 : index
    %9 = vector.load %arg2[%c1_10, %c0_11, %c0_12] : memref<9x64x64xbf16, #tpu.memory_space<vmem>>, vector<1x64x64xbf16>
    %10 = vector.shape_cast %9 : vector<1x64x64xbf16> to vector<64x64xbf16>
    %cst_13 = arith.constant dense<0.000000e+00> : vector<288x64xf32>
    %11 = tpu.matmul %8, %10, %cst_13 {dimension_numbers = #tpu.dot_dimension_numbers<[1], [0], [0], [1], [0, 0, 1, 1], [], []>} : vector<288x64xbf16>, vector<64x64xbf16>, vector<288x64xf32> -> vector<288x64xf32>
    %12 = arith.addf %5, %11 : vector<288x64xf32>
    %c0_i32_14 = arith.constant 0 : i32
    %c0_i32_15 = arith.constant 0 : i32
    %c0_i32_16 = arith.constant 0 : i32
    %13 = tpu.memref_slice %arg1[%c0_i32_14, %c0_i32_15, %c0_i32_16] : memref<1x342x64xbf16, #tpu.memory_space<vmem>> -> memref<1x342x64xbf16, #tpu.memory_space<vmem>>
    %14 = tpu.memref_squeeze %13 : memref<1x342x64xbf16, #tpu.memory_space<vmem>> -> memref<342x64xbf16, #tpu.memory_space<vmem>>
    %c2 = arith.constant 2 : index
    %c0_17 = arith.constant 0 : index
    %15 = vector.load %14[%c2, %c0_17] : memref<342x64xbf16, #tpu.memory_space<vmem>>, vector<288x64xbf16>
    %c2_18 = arith.constant 2 : index
    %c0_19 = arith.constant 0 : index
    %c0_20 = arith.constant 0 : index
    %16 = vector.load %arg2[%c2_18, %c0_19, %c0_20] : memref<9x64x64xbf16, #tpu.memory_space<vmem>>, vector<1x64x64xbf16>
    %17 = vector.shape_cast %16 : vector<1x64x64xbf16> to vector<64x64xbf16>
    %cst_21 = arith.constant dense<0.000000e+00> : vector<288x64xf32>
    %18 = tpu.matmul %15, %17, %cst_21 {dimension_numbers = #tpu.dot_dimension_numbers<[1], [0], [0], [1], [0, 0, 1, 1], [], []>} : vector<288x64xbf16>, vector<64x64xbf16>, vector<288x64xf32> -> vector<288x64xf32>
    %19 = arith.addf %12, %18 : vector<288x64xf32>
    %c0_i32_22 = arith.constant 0 : i32
    %c0_i32_23 = arith.constant 0 : i32
    %c0_i32_24 = arith.constant 0 : i32
    %20 = tpu.memref_slice %arg1[%c0_i32_22, %c0_i32_23, %c0_i32_24] : memref<1x342x64xbf16, #tpu.memory_space<vmem>> -> memref<1x342x64xbf16, #tpu.memory_space<vmem>>
    %21 = tpu.memref_squeeze %20 : memref<1x342x64xbf16, #tpu.memory_space<vmem>> -> memref<342x64xbf16, #tpu.memory_space<vmem>>
    %c18 = arith.constant 18 : index
    %c0_25 = arith.constant 0 : index
    %22 = vector.load %21[%c18, %c0_25] : memref<342x64xbf16, #tpu.memory_space<vmem>>, vector<288x64xbf16>
    %c3 = arith.constant 3 : index
    %c0_26 = arith.constant 0 : index
    %c0_27 = arith.constant 0 : index
    %23 = vector.load %arg2[%c3, %c0_26, %c0_27] : memref<9x64x64xbf16, #tpu.memory_space<vmem>>, vector<1x64x64xbf16>
    %24 = vector.shape_cast %23 : vector<1x64x64xbf16> to vector<64x64xbf16>
    %cst_28 = arith.constant dense<0.000000e+00> : vector<288x64xf32>
    %25 = tpu.matmul %22, %24, %cst_28 {dimension_numbers = #tpu.dot_dimension_numbers<[1], [0], [0], [1], [0, 0, 1, 1], [], []>} : vector<288x64xbf16>, vector<64x64xbf16>, vector<288x64xf32> -> vector<288x64xf32>
    %26 = arith.addf %19, %25 : vector<288x64xf32>
    %c0_i32_29 = arith.constant 0 : i32
    %c0_i32_30 = arith.constant 0 : i32
    %c0_i32_31 = arith.constant 0 : i32
    %27 = tpu.memref_slice %arg1[%c0_i32_29, %c0_i32_30, %c0_i32_31] : memref<1x342x64xbf16, #tpu.memory_space<vmem>> -> memref<1x342x64xbf16, #tpu.memory_space<vmem>>
    %28 = tpu.memref_squeeze %27 : memref<1x342x64xbf16, #tpu.memory_space<vmem>> -> memref<342x64xbf16, #tpu.memory_space<vmem>>
    %c19 = arith.constant 19 : index
    %c0_32 = arith.constant 0 : index
    %29 = vector.load %28[%c19, %c0_32] : memref<342x64xbf16, #tpu.memory_space<vmem>>, vector<288x64xbf16>
    %c4 = arith.constant 4 : index
    %c0_33 = arith.constant 0 : index
    %c0_34 = arith.constant 0 : index
    %30 = vector.load %arg2[%c4, %c0_33, %c0_34] : memref<9x64x64xbf16, #tpu.memory_space<vmem>>, vector<1x64x64xbf16>
    %31 = vector.shape_cast %30 : vector<1x64x64xbf16> to vector<64x64xbf16>
    %cst_35 = arith.constant dense<0.000000e+00> : vector<288x64xf32>
    %32 = tpu.matmul %29, %31, %cst_35 {dimension_numbers = #tpu.dot_dimension_numbers<[1], [0], [0], [1], [0, 0, 1, 1], [], []>} : vector<288x64xbf16>, vector<64x64xbf16>, vector<288x64xf32> -> vector<288x64xf32>
    %33 = arith.addf %26, %32 : vector<288x64xf32>
    %c0_i32_36 = arith.constant 0 : i32
    %c0_i32_37 = arith.constant 0 : i32
    %c0_i32_38 = arith.constant 0 : i32
    %34 = tpu.memref_slice %arg1[%c0_i32_36, %c0_i32_37, %c0_i32_38] : memref<1x342x64xbf16, #tpu.memory_space<vmem>> -> memref<1x342x64xbf16, #tpu.memory_space<vmem>>
    %35 = tpu.memref_squeeze %34 : memref<1x342x64xbf16, #tpu.memory_space<vmem>> -> memref<342x64xbf16, #tpu.memory_space<vmem>>
    %c20 = arith.constant 20 : index
    %c0_39 = arith.constant 0 : index
    %36 = vector.load %35[%c20, %c0_39] : memref<342x64xbf16, #tpu.memory_space<vmem>>, vector<288x64xbf16>
    %c5 = arith.constant 5 : index
    %c0_40 = arith.constant 0 : index
    %c0_41 = arith.constant 0 : index
    %37 = vector.load %arg2[%c5, %c0_40, %c0_41] : memref<9x64x64xbf16, #tpu.memory_space<vmem>>, vector<1x64x64xbf16>
    %38 = vector.shape_cast %37 : vector<1x64x64xbf16> to vector<64x64xbf16>
    %cst_42 = arith.constant dense<0.000000e+00> : vector<288x64xf32>
    %39 = tpu.matmul %36, %38, %cst_42 {dimension_numbers = #tpu.dot_dimension_numbers<[1], [0], [0], [1], [0, 0, 1, 1], [], []>} : vector<288x64xbf16>, vector<64x64xbf16>, vector<288x64xf32> -> vector<288x64xf32>
    %40 = arith.addf %33, %39 : vector<288x64xf32>
    %c0_i32_43 = arith.constant 0 : i32
    %c0_i32_44 = arith.constant 0 : i32
    %c0_i32_45 = arith.constant 0 : i32
    %41 = tpu.memref_slice %arg1[%c0_i32_43, %c0_i32_44, %c0_i32_45] : memref<1x342x64xbf16, #tpu.memory_space<vmem>> -> memref<1x342x64xbf16, #tpu.memory_space<vmem>>
    %42 = tpu.memref_squeeze %41 : memref<1x342x64xbf16, #tpu.memory_space<vmem>> -> memref<342x64xbf16, #tpu.memory_space<vmem>>
    %c36 = arith.constant 36 : index
    %c0_46 = arith.constant 0 : index
    %43 = vector.load %42[%c36, %c0_46] : memref<342x64xbf16, #tpu.memory_space<vmem>>, vector<288x64xbf16>
    %c6 = arith.constant 6 : index
    %c0_47 = arith.constant 0 : index
    %c0_48 = arith.constant 0 : index
    %44 = vector.load %arg2[%c6, %c0_47, %c0_48] : memref<9x64x64xbf16, #tpu.memory_space<vmem>>, vector<1x64x64xbf16>
    %45 = vector.shape_cast %44 : vector<1x64x64xbf16> to vector<64x64xbf16>
    %cst_49 = arith.constant dense<0.000000e+00> : vector<288x64xf32>
    %46 = tpu.matmul %43, %45, %cst_49 {dimension_numbers = #tpu.dot_dimension_numbers<[1], [0], [0], [1], [0, 0, 1, 1], [], []>} : vector<288x64xbf16>, vector<64x64xbf16>, vector<288x64xf32> -> vector<288x64xf32>
    %47 = arith.addf %40, %46 : vector<288x64xf32>
    %c0_i32_50 = arith.constant 0 : i32
    %c0_i32_51 = arith.constant 0 : i32
    %c0_i32_52 = arith.constant 0 : i32
    %48 = tpu.memref_slice %arg1[%c0_i32_50, %c0_i32_51, %c0_i32_52] : memref<1x342x64xbf16, #tpu.memory_space<vmem>> -> memref<1x342x64xbf16, #tpu.memory_space<vmem>>
    %49 = tpu.memref_squeeze %48 : memref<1x342x64xbf16, #tpu.memory_space<vmem>> -> memref<342x64xbf16, #tpu.memory_space<vmem>>
    %c37 = arith.constant 37 : index
    %c0_53 = arith.constant 0 : index
    %50 = vector.load %49[%c37, %c0_53] : memref<342x64xbf16, #tpu.memory_space<vmem>>, vector<288x64xbf16>
    %c7 = arith.constant 7 : index
    %c0_54 = arith.constant 0 : index
    %c0_55 = arith.constant 0 : index
    %51 = vector.load %arg2[%c7, %c0_54, %c0_55] : memref<9x64x64xbf16, #tpu.memory_space<vmem>>, vector<1x64x64xbf16>
    %52 = vector.shape_cast %51 : vector<1x64x64xbf16> to vector<64x64xbf16>
    %cst_56 = arith.constant dense<0.000000e+00> : vector<288x64xf32>
    %53 = tpu.matmul %50, %52, %cst_56 {dimension_numbers = #tpu.dot_dimension_numbers<[1], [0], [0], [1], [0, 0, 1, 1], [], []>} : vector<288x64xbf16>, vector<64x64xbf16>, vector<288x64xf32> -> vector<288x64xf32>
    %54 = arith.addf %47, %53 : vector<288x64xf32>
    %c0_i32_57 = arith.constant 0 : i32
    %c0_i32_58 = arith.constant 0 : i32
    %c0_i32_59 = arith.constant 0 : i32
    %55 = tpu.memref_slice %arg1[%c0_i32_57, %c0_i32_58, %c0_i32_59] : memref<1x342x64xbf16, #tpu.memory_space<vmem>> -> memref<1x342x64xbf16, #tpu.memory_space<vmem>>
    %56 = tpu.memref_squeeze %55 : memref<1x342x64xbf16, #tpu.memory_space<vmem>> -> memref<342x64xbf16, #tpu.memory_space<vmem>>
    %c38 = arith.constant 38 : index
    %c0_60 = arith.constant 0 : index
    %57 = vector.load %56[%c38, %c0_60] : memref<342x64xbf16, #tpu.memory_space<vmem>>, vector<288x64xbf16>
    %c8 = arith.constant 8 : index
    %c0_61 = arith.constant 0 : index
    %c0_62 = arith.constant 0 : index
    %58 = vector.load %arg2[%c8, %c0_61, %c0_62] : memref<9x64x64xbf16, #tpu.memory_space<vmem>>, vector<1x64x64xbf16>
    %59 = vector.shape_cast %58 : vector<1x64x64xbf16> to vector<64x64xbf16>
    %cst_63 = arith.constant dense<0.000000e+00> : vector<288x64xf32>
    %60 = tpu.matmul %57, %59, %cst_63 {dimension_numbers = #tpu.dot_dimension_numbers<[1], [0], [0], [1], [0, 0, 1, 1], [], []>} : vector<288x64xbf16>, vector<64x64xbf16>, vector<288x64xf32> -> vector<288x64xf32>
    %61 = arith.addf %54, %60 : vector<288x64xf32>
    %c0_64 = arith.constant 0 : index
    %c0_65 = arith.constant 0 : index
    %62 = vector.load %arg3[%c0_64, %c0_65] : memref<1x64xf32, #tpu.memory_space<vmem>>, vector<1x64xf32>
    %63 = vector.broadcast %62 : vector<1x64xf32> to vector<288x64xf32>
    %64 = arith.addf %61, %63 : vector<288x64xf32>
    %cst_66 = arith.constant 0.000000e+00 : f32
    %65 = vector.broadcast %cst_66 : f32 to vector<288x64xf32>
    %66 = arith.maximumf %64, %65 : vector<288x64xf32>
    %67 = arith.truncf %66 : vector<288x64xf32> to vector<288x64xbf16>
    %c0_67 = arith.constant 0 : index
    %c0_68 = arith.constant 0 : index
    %68 = vector.load %arg4[%c0_67, %c0_68] : memref<64x64xbf16, #tpu.memory_space<vmem>>, vector<64x64xbf16>
    %cst_69 = arith.constant dense<0.000000e+00> : vector<288x64xf32>
    %69 = tpu.matmul %67, %68, %cst_69 {dimension_numbers = #tpu.dot_dimension_numbers<[1], [0], [0], [1], [0, 0, 1, 1], [], []>} : vector<288x64xbf16>, vector<64x64xbf16>, vector<288x64xf32> -> vector<288x64xf32>
    %c0_70 = arith.constant 0 : index
    %c0_71 = arith.constant 0 : index
    %70 = vector.load %arg5[%c0_70, %c0_71] : memref<1x64xf32, #tpu.memory_space<vmem>>, vector<1x64xf32>
    %71 = vector.broadcast %70 : vector<1x64xf32> to vector<288x64xf32>
    %72 = arith.addf %69, %71 : vector<288x64xf32>
    %cst_72 = arith.constant 0.000000e+00 : f32
    %73 = vector.broadcast %cst_72 : f32 to vector<288x64xf32>
    %74 = arith.maximumf %72, %73 : vector<288x64xf32>
    %75 = arith.truncf %74 : vector<288x64xf32> to vector<288x64xbf16>
    %c0_73 = arith.constant 0 : index
    %c0_74 = arith.constant 0 : index
    %c0_75 = arith.constant 0 : index
    %76 = vector.load %arg6[%c0_73, %c0_74, %c0_75] : memref<1x288x64xbf16, #tpu.memory_space<vmem>>, vector<1x288x64xbf16>
    %77 = vector.shape_cast %76 : vector<1x288x64xbf16> to vector<288x64xbf16>
    %78 = vector.shape_cast %75 : vector<288x64xbf16> to vector<1x288x64xbf16>
    tpu.vector_store %arg6[%c0_73, %c0_74, %c0_75], %78 {strides = array<i32>} : memref<1x288x64xbf16, #tpu.memory_space<vmem>>, vector<1x288x64xbf16>,
    return
  }
  func.func @transform_0(%arg0: i32) -> (i32, i32, i32) {
    %c0_i32 = arith.constant 0 : i32
    %c0_i32_0 = arith.constant 0 : i32
    %c0_i32_1 = arith.constant 0 : i32
    return %arg0, %c0_i32, %c0_i32_0 : i32, i32, i32
  }
  func.func @transform_1(%arg0: i32) -> (i32, i32, i32) {
    %c0_i32 = arith.constant 0 : i32
    %c0_i32_0 = arith.constant 0 : i32
    %c0_i32_1 = arith.constant 0 : i32
    %c0_i32_2 = arith.constant 0 : i32
    return %c0_i32, %c0_i32_0, %c0_i32_1 : i32, i32, i32
  }
  func.func @transform_2(%arg0: i32) -> (i32, i32) {
    %c0_i32 = arith.constant 0 : i32
    %c0_i32_0 = arith.constant 0 : i32
    %c0_i32_1 = arith.constant 0 : i32
    return %c0_i32, %c0_i32_0 : i32, i32
  }
  func.func @transform_3(%arg0: i32) -> (i32, i32) {
    %c0_i32 = arith.constant 0 : i32
    %c0_i32_0 = arith.constant 0 : i32
    %c0_i32_1 = arith.constant 0 : i32
    return %c0_i32, %c0_i32_0 : i32, i32
  }
  func.func @transform_4(%arg0: i32) -> (i32, i32) {
    %c0_i32 = arith.constant 0 : i32
    %c0_i32_0 = arith.constant 0 : i32
    %c0_i32_1 = arith.constant 0 : i32
    return %c0_i32, %c0_i32_0 : i32, i32
  }
  func.func @transform_5(%arg0: i32) -> (i32, i32, i32) {
    %c0_i32 = arith.constant 0 : i32
    %c0_i32_0 = arith.constant 0 : i32
    %c0_i32_1 = arith.constant 0 : i32
    return %arg0, %c0_i32, %c0_i32_0 : i32, i32, i32
  }
}

</mosaic_0001>

<bundles_post_ra>
// kernel: _convblock_call.1
= control target key start
LH: loop header
LB: loop body
LE: loop exit
PB: predicated region body
PF: predicated region fallthrough
CT: control target
= control target key end

     0   :  { %vm168_vm0 = vsmask.f32 7424  ;;  %vm341_vm1 = vcmask 523264   ;;  %vm1632_vm2 = vsmask.f32 6400  ;;  %vm2107_vm3 = vcmask 1045504   ;;  %s7190_s1 = inlined_call_operand.vmem [shape: bf16[9,64,64], index: 1, kind: input, shape index: {}]   ;;  %s7191_s0 = inlined_call_operand.vmem [shape: bf16[1,342,64], index: 0, kind: input, shape index: {}]   ;;  %s7192_s3 = inlined_call_operand.vmem [shape: bf16[64,64], index: 3, kind: input, shape index: {}]   ;;  %s7193_s2 = inlined_call_operand.vmem [shape: f32[1,64], index: 2, kind: input, shape index: {}]   ;;  %s7194_s4 = inlined_call_operand.vmem [shape: f32[1,64], index: 4, kind: input, shape index: {}]   ;;  %s7195_s5 = inlined_call_operand.vmem [shape: bf16[1,288,64], index: 5, kind: output, shape index: {}]  }
   0x1   :  { %v5676_v0 = vld [vmem:[%s7190_s1 + $0x20] sm:$0xff]   ;;  %v5678_v2 = vld [vmem:[%s7190_s1 + $0x28] sm:$0xff]   ;;  %v5680_v4 = vld [vmem:[%s7190_s1 + $0x30] sm:$0xff]   ;;  %vm823_vm4 = vcmask 1046528   ;;  %vm2916_vm5 = vsmask.f32 5376 }
   0x2   :  { %v5677_v1 = vld [vmem:[%s7190_s1 + $0x80] sm:$0xff]   ;;  %4948 = vmatprep.subr.bf16.mxu1 %v5676_v0  ;;  %v5679_v3 = vld [vmem:[%s7190_s1 + $0x88] sm:$0xff]   ;;  %v5681_v5 = vld [vmem:[%s7190_s1 + $0x90] sm:$0xff]   ;;  %vm3391_vm6 = vcmask 1044480   ;;  %vm4267_vm7 = vcmask 519168  }
   0x3   :  { %5124 = vmatprep.subr.bf16.mxu0 %v5677_v1  ;;  %4949 = vmatpush3.bf16.msra.mxu1 %v5676_v0  ;;  %v5682_v6 = vld [vmem:[%s7190_s1 + $0x38] sm:$0xff]   ;;  %v21_v8 = vld [vmem:[%s7191_s0] sm:$0xf]  ;;  %v22_v9 = vld [vmem:[%s7191_s0 + $0x4] sm:$0xf] }
   0x4   :  { %5125 = vmatpush3.bf16.msra.mxu0 %v5677_v1  ;;  %4950 = vmatprep.subr.bf16.mxu1 %v5678_v2  ;;  %v5683_v7 = vld [vmem:[%s7190_s1 + $0x98] sm:$0xff]   ;;  %v5863_v10 = vcombine.low %v21_v8, %v22_v9  ;;  %v5868_v11 = vld [vmem:[%s7191_s0 + $0x8] sm:$0xff]   ;;  %v5885_v18 = vld [vmem:[%s7191_s0 + $0x10] sm:$0xff]  }
   0x5   :  { %5126 = vmatprep.subr.bf16.mxu0 %v5679_v3  ;;  %v1152_v12 = vld [vmem:[%s7191_s0 + $0x8] sm:$0xe]  ;;  %v5876_v13 = vld [vmem:[%s7191_s0 + $0xc] sm:$0xf]  ;;  %v177_v16 = vshll.u32 %v5868_v11, 16  ;;  %v181_v17 = vshrl.u32 %v5868_v11, 16 }
   0x6   :  { %v170_v14 = vshrl.u32 %v5863_v10, 16  ;;  %v172_v15 = vshll.u32 %v5863_v10, 16  ;;  %v5890_v19 = vld [vmem:[%s7191_s0 + $0x10] sm:$0xff]   ;;  %v5893_v20 = vcombine.low %v1152_v12, %v5876_v13  ;;  %v1642_v23 = vshrl.u32 %v5885_v18, 16  ;;  %v5903_v28 = vld [vmem:[%s7191_s0 + $0x18] sm:$0xff]   ;;  %v5690_v33 = vld [vmem:[%s7190_s1 + $0xa0] sm:$0xff]  }
   0x7   :  { %4951 = vmatpush3.bf16.msra.mxu1 %v5678_v2  ;;  %v179_v22 = vrot.slane %v177_v16, 1  ;;  %v1645_v24 = vshll.u32 %v5885_v18, 16  ;;  %v185_v27 = vshll.u32 %v5890_v19, 16  ;;  %v5911_v34 = vld [vmem:[%s7191_s0 + $0x18] sm:$0xff]   ;;  %v1651_v38 = vshrl.u32 %v5903_v28, 16  ;;  %v5923_v47 = vld [vmem:[%s7191_s0 + $0x20] sm:$0xff]  }
   0x8   :  { %5127 = vmatpush3.bf16.msra.mxu0 %v5679_v3  ;;  %4952 = vmatprep.subr.bf16.mxu1 %v5680_v4  ;;  %v174_v21 = vrot.slane %v172_v15, 1  ;;  %v1634_v25 = vshrl.u32 %v5893_v20, 16  ;;  %v1637_v26 = vshll.u32 %v5893_v20, 16  ;;  %v1644_v31 = vrot.slane %v1642_v23, 1  ;;  %v5928_v48 = vld [vmem:[%s7191_s0 + $0x20] sm:$0xff]   ;;  %v5938_v56 = vld [vmem:[%s7191_s0 + $0x28] sm:$0xff]  }
   0x9   :  { %5128 = vmatprep.subr.bf16.mxu0 %v5681_v5  ;;  %v183_v30 = vor.u32 %v181_v17, %v179_v22  ;;  %v1647_v32 = vrot.slane %v1645_v24, 2  ;;  %v187_v37 = vrot.slane %v185_v27, 1  ;;  %v1654_v41 = vshll.u32 %v5903_v28, 16  ;;  %v5945_v59 = vld [vmem:[%s7191_s0 + $0x28] sm:$0xff]   ;;  %v5965_v15 = vld [vmem:[%s7191_s0 + $0x30] sm:$0xff]   ;;  %v5972_v23 = vld [vmem:[%s7191_s0 + $0x38] sm:$0xff]  }
   0xa   :  { %v175_v29 = vor.u32 %v174_v21, %v170_v14  ;;  %v1636_v35 = vrot.slane %v1634_v25, 1  ;;  %v1639_v36 = vrot.slane %v1637_v26, 2  ;;  %v189_v42 = vshrl.u32 %v5890_v19, 16  ;;  %v5699_v24 = vld [vmem:[%s7190_s1 + $0xa8] sm:$0xff]  }
   0xb   :  { %4953 = vmatpush3.bf16.msra.mxu1 %v5680_v4  ;;  %v1648_v40 = vor.u32 %v1647_v32, %v1644_v31  ;;  %v188_v44 = vsel %vm168_vm0, %v183_v30, %v187_v37  ;;  %v1653_v45 = vrot.slane %v1651_v38, 1  ;;  %v193_v46 = vshll.u32 %v5911_v34, 16  ;;  %v5955_v4 = vld [vmem:[%s7191_s0 + $0x30] sm:$0xff]   ;;  %v5984_v30 = vld [vmem:[%s7191_s0 + $0x38] sm:$0xff]  }
   0xc   :  { %5129 = vmatpush3.bf16.msra.mxu0 %v5681_v5  ;;  %4954 = vmatprep.subr.bf16.mxu1 %v5682_v6  ;;  %v180_v39 = vsel %vm168_vm0, %v175_v29, %v179_v22  ;;  %v1640_v43 = vor.u32 %v1639_v36, %v1636_v35  ;;  %v1656_v49 = vrot.slane %v1654_v41, 2  ;;  %v191_v50 = vor.u32 %v189_v42, %v187_v37  ;;  %v5992_v36 = vld [vmem:[%s7191_s0 + $0x40] sm:$0xff]  }
   0xd   :  { %5130 = vmatprep.subr.bf16.mxu0 %v5683_v7  ;;  %4956 = vmatprep.mubr.msk.bf16.mxu1 %vm341_vm1, %v180_v39  ;;  %v197_v51 = vshrl.u32 %v5911_v34, 16  ;;  %v195_v53 = vrot.slane %v193_v46, 1  ;;  %v1660_v54 = vshrl.u32 %v5923_v47, 16  ;;  %v1663_v55 = vshll.u32 %v5923_v47, 16 }
   0xe   :  { %v1649_v52 = vsel %vm1632_vm2, %v1640_v43, %v1648_v40  ;;  %v1657_v57 = vor.u32 %v1656_v49, %v1653_v45  ;;  %v201_v58 = vshll.u32 %v5928_v48, 16  ;;  %v1669_v2 = vshrl.u32 %v5938_v56, 16  ;;  %v6001_v45 = vld [vmem:[%s7191_s0 + $0x40] sm:$0xff]  }
   0xf   :  { %4955 = vmatpush3.bf16.msra.mxu1 %v5682_v6  ;;  %5132 = vmatprep.mubr.msk.bf16.mxu0 %vm341_vm1, %v1649_v52  ;;  %v196_v60 = vsel %vm168_vm0, %v191_v50, %v195_v53  ;;  %v1662_v61 = vrot.slane %v1660_v54, 1  ;;  %v1665_v62 = vrot.slane %v1663_v55, 2  ;;  %v199_v63 = vor.u32 %v197_v51, %v195_v53 }
  0x10   :  { %5131 = vmatpush3.bf16.msra.mxu0 %v5683_v7  ;;  %v1658_v0 = vsel %vm1632_vm2, %v1648_v40, %v1657_v57  ;;  %v203_v1 = vrot.slane %v201_v58, 1  ;;  %v1672_v3 = vshll.u32 %v5938_v56, 16  ;;  %v205_v6 = vshrl.u32 %v5928_v48, 16 }
  0x11   :  { %5168 = vmatprep.subr.bf16.mxu0 %v5690_v33  ;;  %v1666_v5 = vor.u32 %v1665_v62, %v1662_v61  ;;  %v209_v7 = vshll.u32 %v5945_v59, 16  ;;  %v1671_v9 = vrot.slane %v1669_v2, 1  ;;  %v1678_v14 = vshrl.u32 %v5955_v4, 16  ;;  %v6014_v61 = vld [vmem:[%s7191_s0 + $0x48] sm:$0xff]  }
  0x12   :  { %4957 = vmatmul.mubr.msk.bf16.vlgmr.msra.gmra.mrb[0].mxu1 %vm341_vm1, %v188_v44  ;;  %v204_v8 = vsel %vm168_vm0, %v199_v63, %v203_v1  ;;  %v1674_v12 = vrot.slane %v1672_v3, 2  ;;  %v207_v17 = vor.u32 %v205_v6, %v203_v1  ;;  %v1681_v22 = vshll.u32 %v5955_v4, 16 }
  0x13   :  { %4960 = vmatprep.mubr.msk.bf16.mxu1 %vm341_vm1, %v196_v60  ;;  %5133 = vmatmul.mubr.msk.bf16.vlgmr.msra.gmra.mrb[0].mxu0 %vm341_vm1, %v1658_v0  ;;  %v1667_v16 = vsel %vm1632_vm2, %v1657_v57, %v1666_v5  ;;  %v211_v21 = vrot.slane %v209_v7, 1  ;;  %v1680_v26 = vrot.slane %v1678_v14, 1  ;;  %v213_v27 = vshrl.u32 %v5945_v59, 16  ;;  %v6020_v0 = vld [vmem:[%s7191_s0 + $0x48] sm:$0xff]   ;;  %v6029_v7 = vld [vmem:[%s7191_s0 + $0x50] sm:$0xff]  }
  0x14   :  { %5169 = vmatpush3.bf16.msra.mxu0 %v5690_v33  ;;  %5136 = vmatprep.mubr.msk.bf16.mxu0 %vm341_vm1, %v1667_v16  ;;  %v1675_v25 = vor.u32 %v1674_v12, %v1671_v9  ;;  %v217_v29 = vshll.u32 %v5965_v15, 16  ;;  %v1683_v32 = vrot.slane %v1681_v22, 2  ;;  %v1687_v33 = vshrl.u32 %v5972_v23, 16  ;;  %v6036_v9 = vld [vmem:[%s7191_s0 + $0x50] sm:$0xff]  }
  0x15   :  { %v212_v31 = vsel %vm168_vm0, %v207_v17, %v211_v21  ;;  %v1690_v35 = vshll.u32 %v5972_v23, 16  ;;  %5170 = vmatprep.subr.bf16.mxu0 %v5699_v24  ;;  %v215_v38 = vor.u32 %v213_v27, %v211_v21  ;;  %v221_v40 = vshrl.u32 %v5965_v15, 16 }
  0x16   :  { %v1676_v37 = vsel %vm1632_vm2, %v1666_v5, %v1675_v25  ;;  %v219_v39 = vrot.slane %v217_v29, 1  ;;  %v1684_v41 = vor.u32 %v1683_v32, %v1680_v26  ;;  %v1689_v42 = vrot.slane %v1687_v33, 1  ;;  %v6045_v26 = vld [vmem:[%s7191_s0 + $0x58] sm:$0xff]  }
  0x17   :  { %v1692_v43 = vrot.slane %v1690_v35, 2  ;;  %v225_v44 = vshll.u32 %v5984_v30, 16  ;;  %v1696_v49 = vshrl.u32 %v5992_v36, 16  ;;  %v1699_v50 = vshll.u32 %v5992_v36, 16 }
  0x18   :  { %5171 = vmatpush3.bf16.msra.mxu0 %v5699_v24  ;;  %v223_v46 = vor.u32 %v221_v40, %v219_v39  ;;  %v1685_v51 = vsel %vm1632_vm2, %v1675_v25, %v1684_v41  ;;  %v220_v52 = vsel %vm168_vm0, %v215_v38, %v219_v39  ;;  %v229_v54 = vshrl.u32 %v5984_v30, 16  ;;  %v5708_v38 = vld [vmem:[%s7190_s1 + $0xb0] sm:$0xff]  }
  0x19   :  { %v227_v53 = vrot.slane %v225_v44, 1  ;;  %v1693_v55 = vor.u32 %v1692_v43, %v1689_v42  ;;  %v1698_v57 = vrot.slane %v1696_v49, 1  ;;  %v1701_v58 = vrot.slane %v1699_v50, 2  ;;  %v6066_v42 = vld [vmem:[%s7191_s0 + $0x60] sm:$0xff]   ;;  %5172 = vmatprep.subr.bf16.mxu0 %v5708_v38 }
  0x1a   :  { %4961 = vmatmul.mubr.msk.bf16.gmra.mrb[4].mxu1 %vm341_vm1, %v204_v8  ;;  %v233_v60 = vshll.u32 %v6001_v45, 16  ;;  %v237_v1 = vshrl.u32 %v6001_v45, 16  ;;  %v1705_v5 = vshrl.u32 %v6014_v61, 16  ;;  %v1708_v6 = vshll.u32 %v6014_v61, 16 }
  0x1b   :  { %4964 = vmatprep.mubr.msk.bf16.mxu1 %vm341_vm1, %v212_v31  ;;  %5137 = vmatmul.mubr.msk.bf16.gmra.mrb[4].mxu0 %vm341_vm1, %v1676_v37  ;;  %v228_v62 = vsel %vm168_vm0, %v223_v46, %v227_v53  ;;  %v231_v63 = vor.u32 %v229_v54, %v227_v53  ;;  %v1702_v2 = vor.u32 %v1701_v58, %v1698_v57  ;;  %v241_v8 = vshll.u32 %v6020_v0, 16 }
  0x1c   :  { %5140 = vmatprep.mubr.msk.bf16.mxu0 %vm341_vm1, %v1685_v51  ;;  %v235_v3 = vrot.slane %v233_v60, 1  ;;  %v1694_v12 = vsel %vm1632_vm2, %v1684_v41, %v1693_v55  ;;  %v1707_v16 = vrot.slane %v1705_v5, 1  ;;  %v1710_v17 = vrot.slane %v1708_v6, 2  ;;  %v6061_v41 = vld [vmem:[%s7191_s0 + $0x58] sm:$0xff]   ;;  %5173 = vmatpush3.bf16.msra.mxu0 %v5708_v38  ;;  %v6075_v51 = vld [vmem:[%s7191_s0 + $0x60] sm:$0xff]   ;;  %v6095_v6 = vld [vmem:[%s7191_s0 + $0x70] sm:$0xff]  }
  0x1d   :  { %v1703_v14 = vsel %vm1632_vm2, %v1693_v55, %v1702_v2  ;;  %v243_v22 = vrot.slane %v241_v8, 1  ;;  %v1714_v24 = vshrl.u32 %v6029_v7, 16  ;;  %v1717_v25 = vshll.u32 %v6029_v7, 16 }
  0x1e   :  { %v239_v21 = vor.u32 %v237_v1, %v235_v3  ;;  %v236_v27 = vsel %vm168_vm0, %v231_v63, %v235_v3  ;;  %v245_v29 = vshrl.u32 %v6020_v0, 16  ;;  %v249_v31 = vshll.u32 %v6036_v9, 16  ;;  %v6083_v63 = vld [vmem:[%s7191_s0 + $0x68] sm:$0xff]  }
  0x1f   :  { %v1711_v32 = vor.u32 %v1710_v17, %v1707_v16  ;;  %v1716_v33 = vrot.slane %v1714_v24, 1  ;;  %v1719_v35 = vrot.slane %v1717_v25, 2  ;;  %v1723_v37 = vshrl.u32 %v6045_v26, 16 }
  0x20   :  { %v244_v39 = vsel %vm168_vm0, %v239_v21, %v243_v22  ;;  %v1726_v40 = vshll.u32 %v6045_v26, 16  ;;  %v253_v44 = vshrl.u32 %v6036_v9, 16  ;;  %v251_v46 = vrot.slane %v249_v31, 1 }
  0x21   :  { %v1720_v43 = vor.u32 %v1719_v35, %v1716_v33  ;;  %v257_v49 = vshll.u32 %v6061_v41, 16  ;;  %v1732_v50 = vshrl.u32 %v6066_v42, 16  ;;  %v247_v53 = vor.u32 %v245_v29, %v243_v22  ;;  %v6117_v33 = vld [vmem:[%s7191_s0 + $0x78] sm:$0xff]  }
  0x22   :  { %4965 = vmatmul.mubr.msk.bf16.gmra.mrb[8].mxu1 %vm341_vm1, %v220_v52  ;;  %v1712_v52 = vsel %vm1632_vm2, %v1702_v2, %v1711_v32  ;;  %v1725_v54 = vrot.slane %v1723_v37, 1  ;;  %v1735_v55 = vshll.u32 %v6066_v42, 16  ;;  %v1728_v57 = vrot.slane %v1726_v40, 2  ;;  %v6089_v2 = vld [vmem:[%s7191_s0 + $0x68] sm:$0xff]  }
  0x23   :  { %4968 = vmatprep.mubr.msk.bf16.mxu1 %vm341_vm1, %v228_v62  ;;  %5141 = vmatmul.mubr.msk.bf16.gmra.mrb[8].mxu0 %vm341_vm1, %v1694_v12  ;;  %v255_v58 = vor.u32 %v253_v44, %v251_v46  ;;  %v259_v60 = vrot.slane %v257_v49, 1  ;;  %v1734_v62 = vrot.slane %v1732_v50, 1  ;;  %v1721_v1 = vsel %vm1632_vm2, %v1711_v32, %v1720_v43  ;;  %v6112_v32 = vld [vmem:[%s7191_s0 + $0x70] sm:$0xff]   ;;  %v6127_v49 = vld [vmem:[%s7191_s0 + $0x78] sm:$0xff]  }
  0x24   :  { %5144 = vmatprep.mubr.msk.bf16.mxu0 %vm341_vm1, %v1703_v14  ;;  %v1737_v3 = vrot.slane %v1735_v55, 2  ;;  %v265_v5 = vshll.u32 %v6075_v51, 16  ;;  %v252_v8 = vsel %vm168_vm0, %v247_v53, %v251_v46  ;;  %v261_v12 = vshrl.u32 %v6061_v41, 16  ;;  %v6134_v55 = vld [vmem:[%s7191_s0 + $0x80] sm:$0xff]  }
  0x25   :  { %v1741_v14 = vshrl.u32 %v6083_v63, 16  ;;  %v1744_v16 = vshll.u32 %v6083_v63, 16  ;;  %v1729_v17 = vor.u32 %v1728_v57, %v1725_v54  ;;  %v260_v21 = vsel %vm168_vm0, %v255_v58, %v259_v60 }
  0x26   :  { %v269_v22 = vshrl.u32 %v6075_v51, 16  ;;  %v273_v24 = vshll.u32 %v6089_v2, 16  ;;  %v1738_v25 = vor.u32 %v1737_v3, %v1734_v62  ;;  %v1753_v29 = vshll.u32 %v6095_v6, 16  ;;  %v5721_v62 = vld [vmem:[%s7190_s1] sm:$0xff]  }
  0x27   :  { %v267_v31 = vrot.slane %v265_v5, 1  ;;  %v263_v35 = vor.u32 %v261_v12, %v259_v60  ;;  %v1743_v37 = vrot.slane %v1741_v14, 1  ;;  %v1746_v38 = vrot.slane %v1744_v16, 2  ;;  %v6151_v12 = vld [vmem:[%s7191_s0 + $0x80] sm:$0xff]   ;;  %4992 = vmatprep.subr.bf16.mxu1 %v5721_v62 }
  0x28   :  { %v1730_v40 = vsel %vm1632_vm2, %v1720_v43, %v1729_v17  ;;  %v275_v46 = vrot.slane %v273_v24, 1  ;;  %v1739_v50 = vsel %vm1632_vm2, %v1729_v17, %v1738_v25  ;;  %v1755_v53 = vrot.slane %v1753_v29, 2  ;;  %4993 = vmatpush3.bf16.msra.mxu1 %v5721_v62 }
  0x29   :  { %v271_v44 = vor.u32 %v269_v22, %v267_v31  ;;  %v277_v54 = vshrl.u32 %v6089_v2, 16  ;;  %v281_v43 = vshll.u32 %v6112_v32, 16  ;;  %v1759_v57 = vshrl.u32 %v6117_v33, 16  ;;  %v6159_v22 = vld [vmem:[%s7191_s0 + $0x88] sm:$0xff]  }
  0x2a   :  { %4969 = vmatmul.mubr.msk.bf16.gmra.mrb[12].mxu1 %vm341_vm1, %v236_v27  ;;  %v1750_v27 = vshrl.u32 %v6095_v6, 16  ;;  %v268_v58 = vsel %vm168_vm0, %v263_v35, %v267_v31  ;;  %v1762_v60 = vshll.u32 %v6117_v33, 16  ;;  %v285_v5 = vshrl.u32 %v6112_v32, 16  ;;  %v5723_v31 = vld [vmem:[%s7190_s1 + $0x8] sm:$0xff]  }
  0x2b   :  { %4972 = vmatprep.mubr.msk.bf16.mxu1 %vm341_vm1, %v244_v39  ;;  %5145 = vmatmul.mubr.msk.bf16.gmra.mrb[12].mxu0 %vm341_vm1, %v1712_v52  ;;  %v5717_v39 = vld [vmem:[%s7190_s1 + $0xb8] sm:$0xff]   ;;  %v276_v3 = vsel %vm168_vm0, %v271_v44, %v275_v46  ;;  %v1768_v16 = vshrl.u32 %v6134_v55, 16  ;;  %v1771_v17 = vshll.u32 %v6134_v55, 16  ;;  %v279_v24 = vor.u32 %v277_v54, %v275_v46 }
  0x2c   :  { %5148 = vmatprep.mubr.msk.bf16.mxu0 %vm341_vm1, %v1721_v1  ;;  %v1752_v52 = vrot.slane %v1750_v27, 1  ;;  %5174 = vmatprep.subr.bf16.mxu0 %v5717_v39  ;;  %v1747_v1 = vor.u32 %v1746_v38, %v1743_v37  ;;  %v1761_v27 = vrot.slane %v1759_v57, 1  ;;  %v1764_v29 = vrot.slane %v1762_v60, 2 }
  0x2d   :  { %5175 = vmatpush3.bf16.msra.mxu0 %v5717_v39  ;;  %v6169_v39 = vld [vmem:[%s7191_s0 + $0x88] sm:$0xff]   ;;  %v1770_v44 = vrot.slane %v1768_v16, 1  ;;  %v1773_v46 = vrot.slane %v1771_v17, 2  ;;  %4994 = vmatprep.subr.bf16.mxu1 %v5723_v31  ;;  %v301_v60 = vshrl.u32 %v6151_v12, 16 }
  0x2e   :  { %v1756_v14 = vor.u32 %v1755_v53, %v1752_v52  ;;  %v1748_v35 = vsel %vm1632_vm2, %v1738_v25, %v1747_v1  ;;  %v6176_v52 = vld [vmem:[%s7191_s0 + $0x90] sm:$0xff]   ;;  %v293_v25 = vshrl.u32 %v6127_v49, 16  ;;  %v1777_v53 = vshrl.u32 %v6159_v22, 16  ;;  %4995 = vmatpush3.bf16.msra.mxu1 %v5723_v31  ;;  %v5731_v31 = vld [vmem:[%s7190_s1 + $0xc0] sm:$0xff]  }
  0x2f   :  { %v1765_v57 = vor.u32 %v1764_v29, %v1761_v27  ;;  %v305_v62 = vshll.u32 %v6169_v39, 16  ;;  %v1786_v16 = vshrl.u32 %v6176_v52, 16  ;;  %v1789_v17 = vshll.u32 %v6176_v52, 16  ;;  %v6199_v27 = vld [vmem:[%s7191_s0 + $0x90] ss:$0 sps:$4 sm:$0x11]   ;;  %5212 = vmatprep.subr.bf16.mxu0 %v5731_v31 }
  0x30   :  { %v5728_v29 = vld [vmem:[%s7191_s0 + $0x98] ss:$0 sps:$4 sm:$0x33]  }
  0x32   :  { %4973 = vmatmul.mubr.msk.bf16.gmra.mrb[16].mxu1 %vm341_vm1, %v252_v8  ;;  %v289_v8 = vshll.u32 %v6127_v49, 16 }
  0x33   :  { %4976 = vmatprep.mubr.msk.bf16.mxu1 %vm341_vm1, %v260_v21  ;;  %5149 = vmatmul.mubr.msk.bf16.gmra.mrb[16].mxu0 %vm341_vm1, %v1730_v40  ;;  %v283_v21 = vrot.slane %v281_v43, 1  ;;  %v1757_v40 = vsel %vm1632_vm2, %v1747_v1, %v1756_v14  ;;  %v1780_v43 = vshll.u32 %v6159_v22, 16  ;;  %v5727_v1 = vld [vmem:[%s7190_s1 + $0x10] sm:$0xff]  }
  0x34   :  { %5152 = vmatprep.mubr.msk.bf16.mxu0 %vm341_vm1, %v1739_v50  ;;  %v291_v38 = vrot.slane %v289_v8, 1  ;;  %v297_v50 = vshll.u32 %v6151_v12, 16  ;;  %4996 = vmatprep.subr.bf16.mxu1 %v5727_v1 }
  0x35   :  { %v287_v37 = vor.u32 %v285_v5, %v283_v21  ;;  %v284_v54 = vsel %vm168_vm0, %v279_v24, %v283_v21  ;;  %v1774_v5 = vor.u32 %v1773_v46, %v1770_v44  ;;  %v1779_v24 = vrot.slane %v1777_v53, 1  ;;  %4997 = vmatpush3.bf16.msra.mxu1 %v5727_v1 }
  0x36   :  { %v299_v8 = vrot.slane %v297_v50, 1  ;;  %v295_v21 = vor.u32 %v293_v25, %v291_v38  ;;  %v1788_v46 = vrot.slane %v1786_v16, 1  ;;  %v1791_v50 = vrot.slane %v1789_v17, 2 }
  0x37   :  { %v1775_v44 = vsel %vm1632_vm2, %v1765_v57, %v1774_v5  ;;  %v309_v53 = vshrl.u32 %v6169_v39, 16  ;;  %v1798_v1 = vshll.u32 %v5728_v29, 16 }
  0x38   :  { %v300_v25 = vsel %vm168_vm0, %v295_v21, %v299_v8 }
  0x39   :  { %v1800_v17 = vrot.slane %v1798_v1, 2  ;;  %v5738_v1 = vld [vmem:[%s7190_s1 + $0x58] sm:$0xff]  }
  0x3a   :  { %4977 = vmatmul.mubr.msk.bf16.gmra.mrb[20].mxu1 %vm341_vm1, %v268_v58  ;;  %v292_v58 = vsel %vm168_vm0, %v287_v37, %v291_v38  ;;  %v1782_v37 = vrot.slane %v1780_v43, 2  ;;  %v303_v38 = vor.u32 %v301_v60, %v299_v8  ;;  %v5735_v60 = vld [vmem:[%s7190_s1 + $0x40] sm:$0xff]  }
  0x3b   :  { %4980 = vmatprep.mubr.msk.bf16.mxu1 %vm341_vm1, %v276_v3  ;;  %5153 = vmatmul.mubr.msk.bf16.gmra.mrb[20].mxu0 %vm341_vm1, %v1748_v35  ;;  %v5729_v3 = vld [vmem:[%s7190_s1 + $0x18] sm:$0xff]   ;;  %v1766_v35 = vsel %vm1632_vm2, %v1756_v14, %v1765_v57  ;;  %v1792_v57 = vor.u32 %v1791_v50, %v1788_v46 }
  0x3c   :  { %5156 = vmatprep.mubr.msk.bf16.mxu0 %vm341_vm1, %v1757_v40  ;;  %v307_v40 = vrot.slane %v305_v62, 1  ;;  %4998 = vmatprep.subr.bf16.mxu1 %v5729_v3  ;;  %v1783_v14 = vor.u32 %v1782_v37, %v1779_v24  ;;  %v2094_v62 = vld [vmem:[%s7191_s0 + $0x8] sm:$0xc]  ;;  %v2141_v24 = vrot.slane %v6176_v52, 2 }
  0x3d   :  { %4999 = vmatpush3.bf16.msra.mxu1 %v5729_v3 }
  0x3e   :  { %v308_v43 = vsel %vm168_vm0, %v303_v38, %v307_v40  ;;  %v311_v8 = vor.u32 %v309_v53, %v307_v40  ;;  %5036 = vmatprep.subr.bf16.mxu1 %v5735_v60  ;;  %v1784_v21 = vsel %vm1632_vm2, %v1774_v5, %v1783_v14  ;;  %v1793_v37 = vsel %vm1632_vm2, %v1783_v14, %v1792_v57  ;;  %v5736_v53 = vld [vmem:[%s7190_s1 + $0x48] sm:$0xff]   ;;  %v6283_v14 = vld [vmem:[%s7190_s1 + $0x60] sm:$0xff]  }
  0x3f   :  { %v4498_v38 = vcombine.low %v2094_v62, %v5876_v13  ;;  %v2127_v62 = vrot.slane %v6045_v26, 2  ;;  %v2133_v26 = vrot.slane %v6095_v6, 2 }
  0x41   :  { %v2108_v46 = vrot.slane %v4498_v38, 2  ;;  %v6359_v38 = vld [vmem:[%s7191_s0 + $0x14] sm:$0xf] }
  0x42   :  { %4981 = vmatmul.mubr.msk.bf16.gmra.mrb[24].mxu1 %vm341_vm1, %v284_v54  ;;  %v313_v54 = vshll.u32 %v6199_v27, 16 }
  0x43   :  { %4984 = vmatprep.mubr.msk.bf16.mxu1 %vm341_vm1, %v292_v58  ;;  %5157 = vmatmul.mubr.msk.bf16.gmra.mrb[24].mxu0 %vm341_vm1, %v1766_v35  ;;  %v1795_v58 = vshrl.u32 %v5728_v29, 16  ;;  %v2143_v35 = vrot.slane %v5728_v29, 2  ;;  %v2109_v29 = vrot.slane %v5885_v18, 2  ;;  %v2113_v18 = vrot.slane %v5923_v47, 2  ;;  %v5737_v47 = vld [vmem:[%s7190_s1 + $0x50] sm:$0xff]  }
  0x44   :  { %5160 = vmatprep.mubr.msk.bf16.mxu0 %vm341_vm1, %v1775_v44  ;;  %v315_v3 = vrot.slane %v313_v54, 1  ;;  %v5732_v54 = vld [vmem:[%s7190_s1 + $0xc8] sm:$0xff]  }
  0x45   :  { %v1797_v16 = vrot.slane %v1795_v58, 1  ;;  %v6231_v44 = vsel %vm2107_vm3, %v2141_v24, %v2143_v35  ;;  %v2110_v50 = vsel %vm2107_vm3, %v2108_v46, %v2109_v29  ;;  %v5733_v58 = vld [vmem:[%s7190_s1 + $0xd0] sm:$0xff]  }
  0x46   :  { %v316_v40 = vsel %vm168_vm0, %v311_v8, %v315_v3  ;;  %v2131_v8 = vrot.slane %v6083_v63, 2  ;;  %v2137_v63 = vrot.slane %v6134_v55, 2  ;;  %v5778_v55 = vld [vmem:[%s7191_s0 + $0x4] sm:$0xf] }
  0x47   :  { %v1801_v5 = vor.u32 %v1800_v17, %v1797_v16  ;;  %v2135_v16 = vrot.slane %v6117_v33, 2  ;;  %v2139_v33 = vrot.slane %v6159_v22, 2 }
  0x48   :  { %v2134_v3 = vsel %vm2107_vm3, %v2131_v8, %v2133_v26 }
  0x49   :  { %v1802_v13 = vsel %vm1632_vm2, %v1792_v57, %v1801_v5  ;;  %v2136_v6 = vsel %vm2107_vm3, %v2133_v26, %v2135_v16  ;;  %v2138_v17 = vsel %vm2107_vm3, %v2135_v16, %v2137_v63  ;;  %v2140_v22 = vsel %vm2107_vm3, %v2137_v63, %v2139_v33  ;;  %v5779_v5 = vld [vmem:[%s7191_s0 + $0x8] sm:$0xff]   ;;  %v5785_v16 = vld [vmem:[%s7191_s0 + $0x38] sm:$0xff]  }
  0x4a   :  { %4985 = vmatmul.mubr.msk.bf16.gmra.mrb[28].mxu1 %vm341_vm1, %v300_v25  ;;  %v2111_v25 = vrot.slane %v5903_v28, 2  ;;  %v825_v46 = vrot.slane %v5779_v5, 1  ;;  %v837_v63 = vrot.slane %v5785_v16, 1  ;;  %v6583_v16 = vld [vmem:[%s7191_s0 + $0x90] sm:$0xff]  }
  0x4b   :  { %4988 = vmatprep.mubr.msk.bf16.mxu1 %vm341_vm1, %v308_v43  ;;  %5161 = vmatmul.mubr.msk.bf16.gmra.mrb[28].mxu0 %vm341_vm1, %v1784_v21  ;;  %v6292_v43 = vld [vmem:[%s7190_s1 + $0xe0] sm:$0xff]  }
  0x4c   :  { %5164 = vmatprep.mubr.msk.bf16.mxu0 %vm341_vm1, %v1793_v37  ;;  %v2114_v28 = vsel %vm2107_vm3, %v2111_v25, %v2113_v18  ;;  %v810_v21 = vld [vmem:[%s7191_s0] sm:$0xe]  ;;  %v2436_v37 = vld [vmem:[%s7191_s0 + $0x10] sm:$0xc] }
  0x4d   :  { %v4387_v35 = vcombine.low %v810_v21, %v5778_v55  ;;  %v5758_v21 = vld [vmem:[%s7190_s1 + $0xf8] sm:$0xff]  }
  0x52   :  { %4989 = vmatmul.mubr.msk.bf16.gmra.mrb[32].mxu1 %vm341_vm1, %v316_v40  ;;  %v824_v40 = vrot.slane %v4387_v35, 1 }
  0x53   :  { %5000 = vmatprep.mubr.msk.bf16.mxu1 %vm341_vm1, %v5863_v10  ;;  %5165 = vmatmul.mubr.msk.bf16.gmra.mrb[32].mxu0 %vm341_vm1, %v1802_v13  ;;  %v2112_v10 = vsel %vm2107_vm3, %v2109_v29, %v2111_v25  ;;  %v2142_v29 = vsel %vm2107_vm3, %v2139_v33, %v2141_v24  ;;  %v6371_v13 = vcombine.low %v2436_v37, %v6359_v38  ;;  %v5780_v24 = vld [vmem:[%s7191_s0 + $0x10] sm:$0xff]  }
  0x54   :  { %5176 = vmatprep.mubr.msk.bf16.mxu0 %vm341_vm1, %v2110_v50  ;;  %v6376_v50 = vld [vmem:[%s7191_s0 + $0x18] sm:$0xff]   ;;  %v826_v25 = vsel %vm823_vm4, %v824_v40, %v825_v46  ;;  %v839_v40 = vrot.slane %v6001_v45, 1 }
  0x55   :  { %v2576_v52 = vrot.slane %v6376_v50, 2 }
  0x5a   :  { %5001 = vmatmul.mubr.msk.bf16.vlgmr.msra.gmra.mrb[0].mxu1 %vm341_vm1, %v5868_v11  ;;  %v2115_v11 = vrot.slane %v5938_v56, 2 }
  0x5b   :  { %5004 = vmatprep.mubr.msk.bf16.mxu1 %vm341_vm1, %v5890_v19  ;;  %5037 = vmatpush3.bf16.msra.mxu1 %v5735_v60  ;;  %v2117_v19 = vrot.slane %v5955_v4, 2  ;;  %v5734_v4 = vld [vmem:[%s7190_s1 + $0xd8] sm:$0xff]   ;;  %v2125_v60 = vrot.slane %v6029_v7, 2 }
  0x5c   :  { %5038 = vmatprep.subr.bf16.mxu1 %v5736_v53  ;;  %5177 = vmatmul.mubr.msk.bf16.vlgmr.msra.gmra.mrb[0].mxu0 %vm341_vm1, %v2112_v10  ;;  %v2116_v56 = vsel %vm2107_vm3, %v2113_v18, %v2115_v11  ;;  %v827_v18 = vrot.slane %v5780_v24, 1  ;;  %v6392_v10 = vld [vmem:[%s7191_s0 + $0x20] sm:$0xff]  }
  0x5d   :  { %5213 = vmatpush3.bf16.msra.mxu0 %v5731_v31  ;;  %5180 = vmatprep.mubr.msk.bf16.mxu0 %vm341_vm1, %v2114_v28  ;;  %v2118_v31 = vsel %vm2107_vm3, %v2115_v11, %v2117_v19  ;;  %v6401_v11 = vld [vmem:[%s7191_s0 + $0x28] sm:$0xff]  }
  0x5e   :  { %5214 = vmatprep.subr.bf16.mxu0 %v5732_v54 }
  0x5f   :  { %5039 = vmatpush3.bf16.msra.mxu1 %v5736_v53  ;;  %v2575_v53 = vrot.slane %v6371_v13, 2 }
  0x60   :  { %5040 = vmatprep.subr.bf16.mxu1 %v5737_v47 }
  0x61   :  { %5215 = vmatpush3.bf16.msra.mxu0 %v5732_v54  ;;  %v5781_v54 = vld [vmem:[%s7191_s0 + $0x18] sm:$0xff]  }
  0x62   :  { %5005 = vmatmul.mubr.msk.bf16.gmra.mrb[4].mxu1 %vm341_vm1, %v5911_v34  ;;  %5216 = vmatprep.subr.bf16.mxu0 %v5733_v58  ;;  %v2119_v34 = vrot.slane %v5972_v23, 2  ;;  %v829_v28 = vrot.slane %v5781_v54, 1 }
  0x63   :  { %5008 = vmatprep.mubr.msk.bf16.mxu1 %vm341_vm1, %v5928_v48  ;;  %5041 = vmatpush3.bf16.msra.mxu1 %v5737_v47  ;;  %v2121_v48 = vrot.slane %v5992_v36, 2  ;;  %v2123_v36 = vrot.slane %v6014_v61, 2  ;;  %v2129_v61 = vrot.slane %v6066_v42, 2  ;;  %v2577_v47 = vsel %vm2107_vm3, %v2575_v53, %v2576_v52  ;;  %v6501_v53 = vld [vmem:[%s7191_s0 + $0x58] sm:$0xff]  }
  0x64   :  { %5042 = vmatprep.subr.bf16.mxu1 %v5738_v1  ;;  %5181 = vmatmul.mubr.msk.bf16.gmra.mrb[4].mxu0 %vm341_vm1, %v2116_v56  ;;  %v2120_v57 = vsel %vm2107_vm3, %v2117_v19, %v2119_v34  ;;  %v828_v19 = vsel %vm823_vm4, %v825_v46, %v827_v18  ;;  %v5762_v56 = vld [vmem:[%s7190_s1 + $0x68] sm:$0xff]   ;;  %v6494_v46 = vld [vmem:[%s7191_s0 + $0x50] sm:$0xff]   ;;  %v2592_v24 = vrot.slane %v6501_v53, 2 }
  0x65   :  { %5184 = vmatprep.mubr.msk.bf16.mxu0 %vm341_vm1, %v2118_v31  ;;  %5217 = vmatpush3.bf16.msra.mxu0 %v5733_v58  ;;  %v2122_v23 = vsel %vm2107_vm3, %v2119_v34, %v2121_v48  ;;  %v2130_v7 = vsel %vm2107_vm3, %v2127_v62, %v2129_v61  ;;  %v2132_v42 = vsel %vm2107_vm3, %v2129_v61, %v2131_v8  ;;  %v2578_v58 = vrot.slane %v6392_v10, 2  ;;  %v5753_v8 = vld [vmem:[%s7190_s1 + $0xf0] sm:$0xff]  }
  0x66   :  { %5218 = vmatprep.subr.bf16.mxu0 %v5734_v4 }
  0x67   :  { %5043 = vmatpush3.bf16.msra.mxu1 %v5738_v1  ;;  %v830_v1 = vsel %vm823_vm4, %v827_v18, %v829_v28  ;;  %v2579_v34 = vsel %vm2107_vm3, %v2576_v52, %v2578_v58  ;;  %v2590_v52 = vrot.slane %v6494_v46, 2  ;;  %v843_v18 = vrot.slane %v6036_v9, 1 }
  0x68   :  { %5080 = vmatprep.subr.bf16.mxu1 %v6283_v14 }
  0x69   :  { %5219 = vmatpush3.bf16.msra.mxu0 %v5734_v4  ;;  %v2580_v4 = vrot.slane %v6401_v11, 2 }
  0x6a   :  { %5009 = vmatmul.mubr.msk.bf16.gmra.mrb[8].mxu1 %vm341_vm1, %v5945_v59  ;;  %5256 = vmatprep.subr.bf16.mxu0 %v6292_v43  ;;  %v2124_v59 = vsel %vm2107_vm3, %v2121_v48, %v2123_v36  ;;  %v6423_v48 = vld [vmem:[%s7191_s0 + $0x30] sm:$0xff]  }
  0x6b   :  { %5012 = vmatprep.mubr.msk.bf16.mxu1 %vm341_vm1, %v5965_v15  ;;  %v2126_v15 = vsel %vm2107_vm3, %v2123_v36, %v2125_v60  ;;  %v2581_v36 = vsel %vm2107_vm3, %v2578_v58, %v2580_v4  ;;  %v6524_v58 = vld [vmem:[%s7191_s0 + $0x68] sm:$0xff]  }
  0x6c   :  { %5185 = vmatmul.mubr.msk.bf16.gmra.mrb[8].mxu0 %vm341_vm1, %v2120_v57  ;;  %v5783_v57 = vld [vmem:[%s7191_s0 + $0x28] sm:$0xff]  }
  0x6d   :  { %5188 = vmatprep.mubr.msk.bf16.mxu0 %vm341_vm1, %v2122_v23  ;;  %v833_v23 = vrot.slane %v5783_v57, 1 }
  0x72   :  { %5013 = vmatmul.mubr.msk.bf16.gmra.mrb[12].mxu1 %vm341_vm1, %v5984_v30  ;;  %v2128_v30 = vsel %vm2107_vm3, %v2125_v60, %v2127_v62  ;;  %v6432_v60 = vld [vmem:[%s7191_s0 + $0x38] sm:$0xff]   ;;  %v2582_v62 = vrot.slane %v6423_v48, 2 }
  0x73   :  { %5016 = vmatprep.mubr.msk.bf16.mxu1 %vm341_vm1, %v6001_v45  ;;  %v840_v45 = vsel %vm823_vm4, %v837_v63, %v839_v40 }
  0x74   :  { %5189 = vmatmul.mubr.msk.bf16.gmra.mrb[12].mxu0 %vm341_vm1, %v2124_v59  ;;  %v5764_v59 = vld [vmem:[%s7190_s1 + $0x70] sm:$0xff]  }
  0x75   :  { %5192 = vmatprep.mubr.msk.bf16.mxu0 %vm341_vm1, %v2126_v15 }
  0x7a   :  { %5017 = vmatmul.mubr.msk.bf16.gmra.mrb[16].mxu1 %vm341_vm1, %v6020_v0 }
  0x7b   :  { %5020 = vmatprep.mubr.msk.bf16.mxu1 %vm341_vm1, %v6036_v9 }
  0x7c   :  { %5193 = vmatmul.mubr.msk.bf16.gmra.mrb[16].mxu0 %vm341_vm1, %v2128_v30  ;;  %v5766_v30 = vld [vmem:[%s7190_s1 + $0x78] sm:$0xff]  }
  0x7d   :  { %5196 = vmatprep.mubr.msk.bf16.mxu0 %vm341_vm1, %v2130_v7  ;;  %v2584_v7 = vrot.slane %v6432_v60, 2 }
  0x82   :  { %5021 = vmatmul.mubr.msk.bf16.gmra.mrb[20].mxu1 %vm341_vm1, %v6061_v41 }
  0x83   :  { %5024 = vmatprep.mubr.msk.bf16.mxu1 %vm341_vm1, %v6075_v51 }
  0x84   :  { %5197 = vmatmul.mubr.msk.bf16.gmra.mrb[20].mxu0 %vm341_vm1, %v2132_v42  ;;  %v2583_v42 = vsel %vm2107_vm3, %v2580_v4, %v2582_v62  ;;  %v2596_v4 = vrot.slane %v6524_v58, 2 }
  0x85   :  { %5200 = vmatprep.mubr.msk.bf16.mxu0 %vm341_vm1, %v2134_v3  ;;  %v6462_v3 = vld [vmem:[%s7191_s0 + $0x40] sm:$0xff]  }
  0x86   :  { %v2586_v55 = vrot.slane %v6462_v3, 2 }
  0x88   :  { %v2587_v5 = vsel %vm2107_vm3, %v2584_v7, %v2586_v55 }
  0x8a   :  { %5025 = vmatmul.mubr.msk.bf16.gmra.mrb[24].mxu1 %vm341_vm1, %v6089_v2 }
  0x8b   :  { %5028 = vmatprep.mubr.msk.bf16.mxu1 %vm341_vm1, %v6112_v32 }
  0x8c   :  { %5201 = vmatmul.mubr.msk.bf16.gmra.mrb[24].mxu0 %vm341_vm1, %v2136_v6  ;;  %v2585_v6 = vsel %vm2107_vm3, %v2582_v62, %v2584_v7  ;;  %v6561_v62 = vld [vmem:[%s7191_s0 + $0x80] sm:$0xff]   ;;  %v6568_v7 = vld [vmem:[%s7191_s0 + $0x88] sm:$0xff]  }
  0x8d   :  { %5204 = vmatprep.mubr.msk.bf16.mxu0 %vm341_vm1, %v2138_v17  ;;  %v6471_v17 = vld [vmem:[%s7191_s0 + $0x48] sm:$0xff]  }
  0x8e   :  { %v2588_v37 = vrot.slane %v6471_v17, 2 }
  0x90   :  { %v2591_v54 = vsel %vm2107_vm3, %v2588_v37, %v2590_v52 }
  0x92   :  { %5029 = vmatmul.mubr.msk.bf16.gmra.mrb[28].mxu1 %vm341_vm1, %v6127_v49 }
  0x93   :  { %5032 = vmatprep.mubr.msk.bf16.mxu1 %vm341_vm1, %v6151_v12 }
  0x94   :  { %5205 = vmatmul.mubr.msk.bf16.gmra.mrb[28].mxu0 %vm341_vm1, %v2140_v22  ;;  %v6485_v22 = vld [vmem:[%s7190_s1 + $0x100] sm:$0xff]  }
  0x95   :  { %5208 = vmatprep.mubr.msk.bf16.mxu0 %vm341_vm1, %v2142_v29  ;;  %v841_v29 = vrot.slane %v6020_v0, 1 }
  0x97   :  { %v842_v0 = vsel %vm823_vm4, %v839_v40, %v841_v29  ;;  %v844_v9 = vsel %vm823_vm4, %v841_v29, %v843_v18  ;;  %v2926_v40 = vshrl.u32 %v6376_v50, 16  ;;  %v859_v29 = vrot.slane %v6199_v27, 1 }
  0x9a   :  { %5033 = vmatmul.mubr.msk.bf16.gmra.mrb[32].mxu1 %vm341_vm1, %v6169_v39 }
  0x9b   :  { %5044 = vmatprep.mubr.msk.bf16.mxu1 %vm341_vm1, %v826_v25  ;;  %v2589_v25 = vsel %vm2107_vm3, %v2586_v55, %v2588_v37  ;;  %v2921_v37 = vshll.u32 %v6371_v13, 16 }
  0x9c   :  { %5209 = vmatmul.mubr.msk.bf16.gmra.mrb[32].mxu0 %vm341_vm1, %v6231_v44  ;;  %v5782_v44 = vld [vmem:[%s7191_s0 + $0x20] sm:$0xff]  }
  0x9d   :  { %5220 = vmatprep.mubr.msk.bf16.mxu0 %vm341_vm1, %v2577_v47  ;;  %v831_v31 = vrot.slane %v5782_v44, 1  ;;  %v845_v47 = vrot.slane %v6061_v41, 1  ;;  %v847_v41 = vrot.slane %v6075_v51, 1 }
  0x9f   :  { %v832_v15 = vsel %vm823_vm4, %v829_v28, %v831_v31  ;;  %v834_v61 = vsel %vm823_vm4, %v831_v31, %v833_v23  ;;  %v6517_v28 = vld [vmem:[%s7191_s0 + $0x60] sm:$0xff]   ;;  %v6539_v31 = vld [vmem:[%s7191_s0 + $0x70] sm:$0xff]   ;;  %v848_v51 = vsel %vm823_vm4, %v845_v47, %v847_v41 }
  0xa2   :  { %5045 = vmatmul.mubr.msk.bf16.vlgmr.msra.gmra.mrb[0].mxu1 %vm341_vm1, %v828_v19  ;;  %v2593_v19 = vsel %vm2107_vm3, %v2590_v52, %v2592_v24  ;;  %v5765_v52 = vld [vmem:[%s7191_s0 + $0xa0] ss:$0 sps:$4 sm:$0x33]  }
  0xa3   :  { %5048 = vmatprep.mubr.msk.bf16.mxu1 %vm341_vm1, %v830_v1  ;;  %5081 = vmatpush3.bf16.msra.mxu1 %v6283_v14  ;;  %v5748_v14 = vld [vmem:[%s7190_s1 + $0xe8] sm:$0xff]   ;;  %v2594_v1 = vrot.slane %v6517_v28, 2 }
  0xa4   :  { %5082 = vmatprep.subr.bf16.mxu1 %v5762_v56  ;;  %5221 = vmatmul.mubr.msk.bf16.vlgmr.msra.gmra.mrb[0].mxu0 %vm341_vm1, %v2579_v34  ;;  %v849_v34 = vrot.slane %v6089_v2, 1  ;;  %v851_v2 = vrot.slane %v6112_v32, 1 }
  0xa5   :  { %5257 = vmatpush3.bf16.msra.mxu0 %v6292_v43  ;;  %5224 = vmatprep.mubr.msk.bf16.mxu0 %vm341_vm1, %v2581_v36  ;;  %v5784_v43 = vld [vmem:[%s7191_s0 + $0x30] sm:$0xff]   ;;  %v2595_v44 = vsel %vm2107_vm3, %v2592_v24, %v2594_v1  ;;  %v2597_v57 = vsel %vm2107_vm3, %v2594_v1, %v2596_v4  ;;  %v2598_v36 = vrot.slane %v6539_v31, 2 }
  0xa6   :  { %5258 = vmatprep.subr.bf16.mxu0 %v5748_v14  ;;  %v835_v26 = vrot.slane %v5784_v43, 1  ;;  %v852_v32 = vsel %vm823_vm4, %v849_v34, %v851_v2 }
  0xa7   :  { %5083 = vmatpush3.bf16.msra.mxu1 %v5762_v56  ;;  %v846_v56 = vsel %vm823_vm4, %v843_v18, %v845_v47  ;;  %v2928_v47 = vrot.slane %v2926_v40, 2  ;;  %v5790_v40 = vld [vmem:[%s7191_s0 + $0x30] sm:$0xff]  }
  0xa8   :  { %5084 = vmatprep.subr.bf16.mxu1 %v5764_v59  ;;  %v836_v33 = vsel %vm823_vm4, %v833_v23, %v835_v26  ;;  %v838_v35 = vsel %vm823_vm4, %v835_v26, %v837_v63  ;;  %v6546_v23 = vld [vmem:[%s7191_s0 + $0x78] sm:$0xff]   ;;  %v2604_v26 = vrot.slane %v6568_v7, 2  ;;  %v857_v63 = vrot.slane %v6169_v39, 1 }
  0xa9   :  { %5259 = vmatpush3.bf16.msra.mxu0 %v5748_v14  ;;  %v850_v14 = vsel %vm823_vm4, %v847_v41, %v849_v34  ;;  %v2918_v39 = vshrl.u32 %v6371_v13, 16  ;;  %v1291_v13 = vrot.slane %v5893_v20, 1  ;;  %v2935_v20 = vshrl.u32 %v6392_v10, 16 }
  0xaa   :  { %5049 = vmatmul.mubr.msk.bf16.gmra.mrb[4].mxu1 %vm341_vm1, %v832_v15  ;;  %5260 = vmatprep.subr.bf16.mxu0 %v5753_v8  ;;  %v2599_v15 = vsel %vm2107_vm3, %v2596_v4, %v2598_v36  ;;  %v860_v27 = vsel %vm823_vm4, %v857_v63, %v859_v29  ;;  %v2947_v34 = vshll.u32 %v6401_v11, 16 }
  0xab   :  { %5052 = vmatprep.mubr.msk.bf16.mxu1 %vm341_vm1, %v834_v61  ;;  %5085 = vmatpush3.bf16.msra.mxu1 %v5764_v59  ;;  %v2600_v59 = vrot.slane %v6546_v23, 2  ;;  %v853_v61 = vrot.slane %v6127_v49, 1  ;;  %v855_v49 = vrot.slane %v6151_v12, 1  ;;  %v2920_v18 = vrot.slane %v2918_v39, 2 }
  0xac   :  { %5086 = vmatprep.subr.bf16.mxu1 %v5766_v30  ;;  %5225 = vmatmul.mubr.msk.bf16.gmra.mrb[4].mxu0 %vm341_vm1, %v2583_v42 }
  0xad   :  { %5228 = vmatprep.mubr.msk.bf16.mxu0 %vm341_vm1, %v2585_v6  ;;  %5261 = vmatpush3.bf16.msra.mxu0 %v5753_v8  ;;  %v2602_v8 = vrot.slane %v6561_v62, 2  ;;  %v854_v43 = vsel %vm823_vm4, %v851_v2, %v853_v61  ;;  %v6589_v6 = vld [vmem:[%s7191_s0 + $0x98] sm:$0xff]   ;;  %v856_v12 = vsel %vm823_vm4, %v853_v61, %v855_v49  ;;  %v858_v55 = vsel %vm823_vm4, %v855_v49, %v857_v63  ;;  %v5788_v2 = vld [vmem:[%s7191_s0 + $0x20] sm:$0xff]  }
  0xae   :  { %5262 = vmatprep.subr.bf16.mxu0 %v5758_v21  ;;  %v2953_v49 = vshrl.u32 %v6423_v48, 16 }
  0xaf   :  { %5087 = vmatpush3.bf16.msra.mxu1 %v5766_v30  ;;  %v2601_v30 = vsel %vm2107_vm3, %v2598_v36, %v2600_v59  ;;  %v2603_v42 = vsel %vm2107_vm3, %v2600_v59, %v2602_v8 }
  0xb0   :  { %v2955_v39 = vrot.slane %v2953_v49, 2 }
  0xb1   :  { %5263 = vmatpush3.bf16.msra.mxu0 %v5758_v21  ;;  %v2605_v21 = vsel %vm2107_vm3, %v2602_v8, %v2604_v26 }
  0xb2   :  { %5053 = vmatmul.mubr.msk.bf16.gmra.mrb[8].mxu1 %vm341_vm1, %v836_v33  ;;  %5300 = vmatprep.subr.bf16.mxu0 %v6485_v22  ;;  %v2606_v33 = vrot.slane %v6583_v16, 2 }
  0xb3   :  { %5056 = vmatprep.mubr.msk.bf16.mxu1 %vm341_vm1, %v838_v35  ;;  %v2608_v35 = vrot.slane %v6589_v6, 2 }
  0xb4   :  { %5229 = vmatmul.mubr.msk.bf16.gmra.mrb[8].mxu0 %vm341_vm1, %v2587_v5  ;;  %v2929_v5 = vshll.u32 %v6376_v50, 16 }
  0xb5   :  { %5232 = vmatprep.mubr.msk.bf16.mxu0 %vm341_vm1, %v2589_v25  ;;  %v2607_v25 = vsel %vm2107_vm3, %v2604_v26, %v2606_v33 }
  0xba   :  { %5057 = vmatmul.mubr.msk.bf16.gmra.mrb[12].mxu1 %vm341_vm1, %v840_v45  ;;  %v2609_v45 = vsel %vm2107_vm3, %v2606_v33, %v2608_v35  ;;  %v5789_v33 = vld [vmem:[%s7191_s0 + $0x28] sm:$0xff]  }
  0xbb   :  { %5060 = vmatprep.mubr.msk.bf16.mxu1 %vm341_vm1, %v842_v0  ;;  %v5786_v0 = vld [vmem:[%s7191_s0 + $0x10] sm:$0xff]  }
  0xbc   :  { %5233 = vmatmul.mubr.msk.bf16.gmra.mrb[12].mxu0 %vm341_vm1, %v2591_v54  ;;  %v1292_v24 = vrot.slane %v5786_v0, 1  ;;  %v2923_v54 = vrot.slane %v2921_v37, 3 }
  0xbd   :  { %5236 = vmatprep.mubr.msk.bf16.mxu0 %vm341_vm1, %v2593_v19  ;;  %v2931_v19 = vrot.slane %v2929_v5, 3  ;;  %v1300_v5 = vrot.slane %v5790_v40, 1 }
  0xbe   :  { %v1293_v1 = vsel %vm823_vm4, %v1291_v13, %v1292_v24  ;;  %v2924_v4 = vor.u32 %v2923_v54, %v2920_v18  ;;  %v2971_v18 = vshrl.u32 %v6462_v3, 16  ;;  %v2974_v54 = vshll.u32 %v6462_v3, 16 }
  0xbf   :  { %v2932_v41 = vor.u32 %v2931_v19, %v2928_v47  ;;  %v2980_v19 = vshrl.u32 %v6471_v17, 16 }
  0xc1   :  { %v2933_v61 = vsel %vm2916_vm5, %v2924_v4, %v2932_v41  ;;  %v2976_v4 = vrot.slane %v2974_v54, 3 }
  0xc2   :  { %5061 = vmatmul.mubr.msk.bf16.gmra.mrb[16].mxu1 %vm341_vm1, %v844_v9  ;;  %v2610_v9 = vrot.slane %v5765_v52, 2  ;;  %v5768_v52 = vld [vmem:[%s7190_s1 + $0x108] sm:$0xff]  }
  0xc3   :  { %5064 = vmatprep.mubr.msk.bf16.mxu1 %vm341_vm1, %v846_v56  ;;  %v2938_v56 = vshll.u32 %v6392_v10, 16 }
  0xc4   :  { %5237 = vmatmul.mubr.msk.bf16.gmra.mrb[16].mxu0 %vm341_vm1, %v2595_v44  ;;  %v2944_v44 = vshrl.u32 %v6401_v11, 16  ;;  %v2611_v36 = vsel %vm2107_vm3, %v2608_v35, %v2610_v9  ;;  %v5769_v9 = vld [vmem:[%s7190_s1 + $0x110] sm:$0xff]  }
  0xc5   :  { %5240 = vmatprep.mubr.msk.bf16.mxu0 %vm341_vm1, %v2597_v57  ;;  %v5787_v57 = vld [vmem:[%s7191_s0 + $0x18] sm:$0xff]   ;;  %v2940_v59 = vrot.slane %v2938_v56, 3  ;;  %v2973_v56 = vrot.slane %v2971_v18, 2 }
  0xca   :  { %5065 = vmatmul.mubr.msk.bf16.gmra.mrb[20].mxu1 %vm341_vm1, %v848_v51  ;;  %v1294_v51 = vrot.slane %v5787_v57, 1  ;;  %v2982_v57 = vrot.slane %v2980_v19, 2 }
  0xcb   :  { %5068 = vmatprep.mubr.msk.bf16.mxu1 %vm341_vm1, %v850_v14  ;;  %v2937_v14 = vrot.slane %v2935_v20, 2 }
  0xcc   :  { %5241 = vmatmul.mubr.msk.bf16.gmra.mrb[20].mxu0 %vm341_vm1, %v2599_v15  ;;  %v1296_v15 = vrot.slane %v5788_v2, 1  ;;  %v1295_v8 = vsel %vm823_vm4, %v1292_v24, %v1294_v51 }
  0xcd   :  { %5244 = vmatprep.mubr.msk.bf16.mxu0 %vm341_vm1, %v2601_v30  ;;  %v2946_v30 = vrot.slane %v2944_v44, 2 }
  0xce   :  { %v1297_v26 = vsel %vm823_vm4, %v1294_v51, %v1296_v15 }
  0xd2   :  { %5069 = vmatmul.mubr.msk.bf16.gmra.mrb[24].mxu1 %vm341_vm1, %v852_v32  ;;  %v2949_v32 = vrot.slane %v2947_v34, 3 }
  0xd3   :  { %5072 = vmatprep.mubr.msk.bf16.mxu1 %vm341_vm1, %v854_v43  ;;  %v2941_v43 = vor.u32 %v2940_v59, %v2937_v14  ;;  %v2977_v59 = vor.u32 %v2976_v4, %v2973_v56  ;;  %v3025_v4 = vshrl.u32 %v6539_v31, 16 }
  0xd4   :  { %5245 = vmatmul.mubr.msk.bf16.gmra.mrb[24].mxu0 %vm341_vm1, %v2603_v42  ;;  %v2956_v42 = vshll.u32 %v6423_v48, 16  ;;  %v2950_v63 = vor.u32 %v2949_v32, %v2946_v30  ;;  %v2998_v32 = vshrl.u32 %v6501_v53, 16 }
  0xd5   :  { %5248 = vmatprep.mubr.msk.bf16.mxu0 %vm341_vm1, %v2605_v21  ;;  %v2962_v21 = vshrl.u32 %v6432_v60, 16  ;;  %v2942_v35 = vsel %vm2916_vm5, %v2932_v41, %v2941_v43  ;;  %v5792_v41 = vld [vmem:[%s7191_s0 + $0x40] sm:$0xff]  }
  0xd6   :  { %v2958_v37 = vrot.slane %v2956_v42, 3  ;;  %v2951_v29 = vsel %vm2916_vm5, %v2941_v43, %v2950_v63  ;;  %v1304_v44 = vrot.slane %v5792_v41, 1  ;;  %v5793_v43 = vld [vmem:[%s7191_s0 + $0x48] sm:$0xff]   ;;  %v3028_v41 = vshll.u32 %v6539_v31, 16 }
  0xd8   :  { %v2959_v0 = vor.u32 %v2958_v37, %v2955_v39 }
  0xda   :  { %5073 = vmatmul.mubr.msk.bf16.gmra.mrb[28].mxu1 %vm341_vm1, %v856_v12  ;;  %v2965_v12 = vshll.u32 %v6432_v60, 16  ;;  %v2960_v20 = vsel %vm2916_vm5, %v2950_v63, %v2959_v0 }
  0xdb   :  { %5076 = vmatprep.mubr.msk.bf16.mxu1 %vm341_vm1, %v858_v55  ;;  %v1298_v55 = vrot.slane %v5789_v33, 1 }
  0xdc   :  { %5249 = vmatmul.mubr.msk.bf16.gmra.mrb[28].mxu0 %vm341_vm1, %v2607_v25  ;;  %v2964_v25 = vrot.slane %v2962_v21, 2  ;;  %v5794_v21 = vld [vmem:[%s7191_s0 + $0x50] sm:$0xff]  }
  0xdd   :  { %5252 = vmatprep.mubr.msk.bf16.mxu0 %vm341_vm1, %v2609_v45  ;;  %v2967_v45 = vrot.slane %v2965_v12, 3  ;;  %v1299_v13 = vsel %vm823_vm4, %v1296_v15, %v1298_v55  ;;  %v1301_v24 = vsel %vm823_vm4, %v1298_v55, %v1300_v5  ;;  %v2989_v15 = vshrl.u32 %v6494_v46, 16 }
  0xde   :  { %v1308_v12 = vrot.slane %v5794_v21, 1  ;;  %v3000_v55 = vrot.slane %v2998_v32, 2 }
  0xdf   :  { %v2968_v47 = vor.u32 %v2967_v45, %v2964_v25  ;;  %v2991_v42 = vrot.slane %v2989_v15, 2  ;;  %v3016_v45 = vshrl.u32 %v6524_v58, 16  ;;  %v5798_v15 = vld [vmem:[%s7191_s0 + $0x70] sm:$0xff]  }
  0xe1   :  { %v2969_v34 = vsel %vm2916_vm5, %v2959_v0, %v2968_v47  ;;  %v2978_v49 = vsel %vm2916_vm5, %v2968_v47, %v2977_v59  ;;  %v5796_v47 = vld [vmem:[%s7191_s0 + $0x60] sm:$0xff]  }
  0xe2   :  { %5077 = vmatmul.mubr.msk.bf16.gmra.mrb[32].mxu1 %vm341_vm1, %v860_v27  ;;  %v2983_v27 = vshll.u32 %v6471_v17, 16  ;;  %v1312_v19 = vrot.slane %v5796_v47, 1 }
  0xe3   :  { %5088 = vmatprep.mubr.msk.bf16.mxu1 %vm341_vm1, %v1293_v1 }
  0xe4   :  { %5253 = vmatmul.mubr.msk.bf16.gmra.mrb[32].mxu0 %vm341_vm1, %v2611_v36  ;;  %v2985_v51 = vrot.slane %v2983_v27, 3  ;;  %v5770_v36 = vld [vmem:[%s7190_s1 + $0x118] sm:$0xff]  }
  0xe5   :  { %5264 = vmatprep.mubr.msk.bf16.mxu0 %vm341_vm1, %v2933_v61  ;;  %v2992_v61 = vshll.u32 %v6494_v46, 16 }
  0xe6   :  { %v2986_v30 = vor.u32 %v2985_v51, %v2982_v57  ;;  %v3037_v57 = vshll.u32 %v6546_v23, 16  ;;  %v5797_v51 = vld [vmem:[%s7191_s0 + $0x68] sm:$0xff]  }
  0xe7   :  { %v2994_v63 = vrot.slane %v2992_v61, 3  ;;  %v1316_v61 = vrot.slane %v5798_v15, 1 }
  0xe8   :  { %v2987_v33 = vsel %vm2916_vm5, %v2977_v59, %v2986_v30  ;;  %v3027_v59 = vrot.slane %v3025_v4, 2  ;;  %v5802_v4 = vld [vmem:[%s7191_s0 + $0x90] sm:$0xff]  }
  0xe9   :  { %v2995_v37 = vor.u32 %v2994_v63, %v2991_v42  ;;  %v3043_v42 = vshrl.u32 %v6561_v62, 16  ;;  %v3046_v63 = vshll.u32 %v6561_v62, 16 }
  0xea   :  { %5089 = vmatmul.mubr.msk.bf16.vlgmr.msra.gmra.mrb[0].mxu1 %vm341_vm1, %v1295_v8  ;;  %v3001_v8 = vshll.u32 %v6501_v53, 16 }
  0xeb   :  { %5092 = vmatprep.mubr.msk.bf16.mxu1 %vm341_vm1, %v1297_v26  ;;  %v1306_v26 = vrot.slane %v5793_v43, 1 }
  0xec   :  { %5265 = vmatmul.mubr.msk.bf16.vlgmr.msra.gmra.mrb[0].mxu0 %vm341_vm1, %v2942_v35  ;;  %v3003_v35 = vrot.slane %v3001_v8, 3  ;;  %v3039_v8 = vrot.slane %v3037_v57, 3 }
  0xed   :  { %5301 = vmatpush3.bf16.msra.mxu0 %v6485_v22  ;;  %5268 = vmatprep.mubr.msk.bf16.mxu0 %vm341_vm1, %v2951_v29  ;;  %v5791_v22 = vld [vmem:[%s7191_s0 + $0x38] sm:$0xff]   ;;  %v1307_v39 = vsel %vm823_vm4, %v1304_v44, %v1306_v26  ;;  %v1309_v40 = vsel %vm823_vm4, %v1306_v26, %v1308_v12  ;;  %v3010_v29 = vshll.u32 %v6517_v28, 16 }
  0xee   :  { %5302 = vmatprep.subr.bf16.mxu0 %v5768_v52  ;;  %v1302_v1 = vrot.slane %v5791_v22, 1  ;;  %v3004_v25 = vor.u32 %v3003_v35, %v3000_v55  ;;  %v5799_v55 = vld [vmem:[%s7191_s0 + $0x78] sm:$0xff]  }
  0xef   :  { %v3012_v54 = vrot.slane %v3010_v29, 3  ;;  %v1318_v35 = vrot.slane %v5799_v55, 1  ;;  %v3393_v55 = vrot.slane %v6376_v50, 3  ;;  %v3399_v50 = vrot.slane %v6423_v48, 3 }
  0xf0   :  { %v1303_v14 = vsel %vm823_vm4, %v1300_v5, %v1302_v1  ;;  %v1305_v2 = vsel %vm823_vm4, %v1302_v1, %v1304_v44  ;;  %v3007_v5 = vshrl.u32 %v6517_v28, 16  ;;  %v3005_v27 = vsel %vm2916_vm5, %v2995_v37, %v3004_v25 }
  0xf1   :  { %5303 = vmatpush3.bf16.msra.mxu0 %v5768_v52  ;;  %v3019_v52 = vshll.u32 %v6524_v58, 16  ;;  %v3407_v48 = vrot.slane %v6494_v46, 3  ;;  %v3413_v46 = vrot.slane %v6524_v58, 3 }
  0xf2   :  { %5093 = vmatmul.mubr.msk.bf16.gmra.mrb[4].mxu1 %vm341_vm1, %v1299_v13  ;;  %5304 = vmatprep.subr.bf16.mxu0 %v5769_v9  ;;  %v5795_v13 = vld [vmem:[%s7191_s0 + $0x58] sm:$0xff]   ;;  %v3009_v18 = vrot.slane %v3007_v5, 2  ;;  %v5800_v5 = vld [vmem:[%s7191_s0 + $0x80] sm:$0xff]  }
  0xf3   :  { %5096 = vmatprep.mubr.msk.bf16.mxu1 %vm341_vm1, %v1301_v24  ;;  %v1310_v0 = vrot.slane %v5795_v13, 1  ;;  %v2996_v24 = vsel %vm2916_vm5, %v2986_v30, %v2995_v37  ;;  %v3021_v22 = vrot.slane %v3019_v52, 3  ;;  %v3045_v37 = vrot.slane %v3043_v42, 2 }
  0xf4   :  { %5269 = vmatmul.mubr.msk.bf16.gmra.mrb[4].mxu0 %vm341_vm1, %v2960_v20  ;;  %v3013_v20 = vor.u32 %v3012_v54, %v3009_v18  ;;  %v1320_v29 = vrot.slane %v5800_v5, 1  ;;  %v1319_v13 = vsel %vm823_vm4, %v1316_v61, %v1318_v35  ;;  %v3061_v18 = vshrl.u32 %v6583_v16, 16 }
  0xf5   :  { %5272 = vmatprep.mubr.msk.bf16.mxu0 %vm341_vm1, %v2969_v34  ;;  %5305 = vmatpush3.bf16.msra.mxu0 %v5769_v9  ;;  %v3018_v9 = vrot.slane %v3016_v45, 2  ;;  %v1311_v1 = vsel %vm823_vm4, %v1308_v12, %v1310_v0  ;;  %v1313_v56 = vsel %vm823_vm4, %v1310_v0, %v1312_v19  ;;  %v3034_v34 = vshrl.u32 %v6546_v23, 16 }
  0xf6   :  { %5306 = vmatprep.subr.bf16.mxu0 %v5770_v36  ;;  %v3052_v12 = vshrl.u32 %v6568_v7, 16  ;;  %v3064_v54 = vshll.u32 %v6583_v16, 16 }
  0xf7   :  { %v3022_v44 = vor.u32 %v3021_v22, %v3018_v9  ;;  %v3036_v32 = vrot.slane %v3034_v34, 2  ;;  %v5801_v9 = vld [vmem:[%s7191_s0 + $0x88] sm:$0xff]  }
  0xf8   :  { %v3054_v45 = vrot.slane %v3052_v12, 2  ;;  %v1322_v22 = vrot.slane %v5801_v9, 1 }
  0xf9   :  { %5307 = vmatpush3.bf16.msra.mxu0 %v5770_v36  ;;  %v1314_v36 = vrot.slane %v5797_v51, 1  ;;  %v3023_v30 = vsel %vm2916_vm5, %v3013_v20, %v3022_v44  ;;  %v3040_v21 = vor.u32 %v3039_v8, %v3036_v32  ;;  %v3378_v32 = vld [vmem:[%s7191_s0 + $0x10] sm:$0x8] }
  0xfa   :  { %5097 = vmatmul.mubr.msk.bf16.gmra.mrb[8].mxu1 %vm341_vm1, %v1303_v14  ;;  %v3014_v14 = vsel %vm2916_vm5, %v3004_v25, %v3013_v20  ;;  %v3063_v20 = vrot.slane %v3061_v18, 2 }
  0xfb   :  { %5100 = vmatprep.mubr.msk.bf16.mxu1 %vm341_vm1, %v1305_v2  ;;  %v3030_v2 = vrot.slane %v3028_v41, 3  ;;  %v1315_v43 = vsel %vm823_vm4, %v1312_v19, %v1314_v36  ;;  %v3070_v19 = vshrl.u32 %v6589_v6, 16  ;;  %v1324_v41 = vrot.slane %v5802_v4, 1 }
  0xfc   :  { %5273 = vmatmul.mubr.msk.bf16.gmra.mrb[8].mxu0 %vm341_vm1, %v2978_v49  ;;  %v1317_v49 = vsel %vm823_vm4, %v1314_v36, %v1316_v61  ;;  %v1323_v36 = vsel %vm823_vm4, %v1320_v29, %v1322_v22 }
  0xfd   :  { %5276 = vmatprep.mubr.msk.bf16.mxu0 %vm341_vm1, %v2987_v33  ;;  %v3031_v26 = vor.u32 %v3030_v2, %v3027_v59  ;;  %v3055_v33 = vshll.u32 %v6568_v7, 16  ;;  %v3072_v57 = vrot.slane %v3070_v19, 2  ;;  %v1325_v2 = vsel %vm823_vm4, %v1322_v22, %v1324_v41 }
  0xfe   :  { %v3417_v19 = vrot.slane %v6546_v23, 3  ;;  %v3423_v23 = vrot.slane %v6583_v16, 3 }
  0xff   :  { %v3041_v25 = vsel %vm2916_vm5, %v3031_v26, %v3040_v21  ;;  %v3057_v52 = vrot.slane %v3055_v33, 3 }
 0x101   :  { %v3058_v47 = vor.u32 %v3057_v52, %v3054_v45 }
 0x102   :  { %5101 = vmatmul.mubr.msk.bf16.gmra.mrb[12].mxu1 %vm341_vm1, %v1307_v39  ;;  %v3032_v39 = vsel %vm2916_vm5, %v3022_v44, %v3031_v26  ;;  %v6770_v44 = vld [vmem:[%s7191_s0 + $0xa0] ss:$0 sps:$4 sm:$0x77]  }
 0x103   :  { %5104 = vmatprep.mubr.msk.bf16.mxu1 %vm341_vm1, %v1309_v40  ;;  %v3048_v40 = vrot.slane %v3046_v63, 3  ;;  %v3079_v15 = vshrl.u32 %v6770_v44, 16  ;;  %v3082_v61 = vshll.u32 %v6770_v44, 16  ;;  %v4609_v63 = vcombine.low %v3378_v32, %v6359_v38 }
 0x104   :  { %5277 = vmatmul.mubr.msk.bf16.gmra.mrb[12].mxu0 %vm341_vm1, %v2996_v24  ;;  %v1321_v24 = vsel %vm823_vm4, %v1318_v35, %v1320_v29  ;;  %v3395_v38 = vrot.slane %v6392_v10, 3  ;;  %v3401_v29 = vrot.slane %v6432_v60, 3  ;;  %v3403_v10 = vrot.slane %v6462_v3, 3 }
 0x105   :  { %5280 = vmatprep.mubr.msk.bf16.mxu0 %vm341_vm1, %v3005_v27  ;;  %v3049_v0 = vor.u32 %v3048_v40, %v3045_v37  ;;  %v3073_v27 = vshll.u32 %v6589_v6, 16  ;;  %v3081_v26 = vrot.slane %v3079_v15, 2  ;;  %v3392_v33 = vrot.slane %v4609_v63, 3 }
 0x106   :  { %v3397_v37 = vrot.slane %v6401_v11, 3  ;;  %v3396_v40 = vsel %vm3391_vm6, %v3393_v55, %v3395_v38  ;;  %v3402_v45 = vsel %vm3391_vm6, %v3399_v50, %v3401_v29  ;;  %v3405_v11 = vrot.slane %v6471_v17, 3 }
 0x107   :  { %v3059_v34 = vsel %vm2916_vm5, %v3049_v0, %v3058_v47  ;;  %v3075_v51 = vrot.slane %v3073_v27, 3  ;;  %v3404_v52 = vsel %vm3391_vm6, %v3401_v29, %v3403_v10  ;;  %v3409_v60 = vrot.slane %v6501_v53, 3 }
 0x108   :  { %v3398_v5 = vsel %vm3391_vm6, %v3395_v38, %v3397_v37  ;;  %v3408_v3 = vsel %vm3391_vm6, %v3405_v11, %v3407_v48  ;;  %v3419_v27 = vrot.slane %v6561_v62, 3  ;;  %v5776_v62 = vld [vmem:[%s7192_s3 + $0x10] sm:$0xff]  }
 0x109   :  { %v3410_v17 = vsel %vm3391_vm6, %v3407_v48, %v3409_v60 }
 0x10a   :  { %5105 = vmatmul.mubr.msk.bf16.gmra.mrb[16].mxu1 %vm341_vm1, %v1311_v1  ;;  %v3050_v1 = vsel %vm2916_vm5, %v3040_v21, %v3049_v0  ;;  %v5774_v0 = vld [vmem:[%s7192_s3] sm:$0xff]   ;;  %v3420_v9 = vsel %vm3391_vm6, %v3417_v19, %v3419_v27 }
 0x10b   :  { %5108 = vmatprep.mubr.msk.bf16.mxu1 %vm341_vm1, %v1313_v56  ;;  %v3066_v56 = vrot.slane %v3064_v54, 3  ;;  %5344 = vmatprep.subr.bf16.mxu1 %v5774_v0  ;;  %v3415_v54 = vrot.slane %v6539_v31, 3  ;;  %v3421_v31 = vrot.slane %v6568_v7, 3  ;;  %v3427_v7 = vrot.slane %v6770_v44, 3 }
 0x10c   :  { %5281 = vmatmul.mubr.msk.bf16.gmra.mrb[16].mxu0 %vm341_vm1, %v3014_v14  ;;  %v5771_v14 = vld [vmem:[%s7191_s0 + $0x98] ss:$0 sps:$4 sm:$0x11]   ;;  %5345 = vmatpush3.bf16.msra.mxu1 %v5774_v0 }
 0x10d   :  { %5284 = vmatprep.mubr.msk.bf16.mxu0 %vm341_vm1, %v3023_v30  ;;  %v3067_v59 = vor.u32 %v3066_v56, %v3063_v20  ;;  %v3076_v30 = vor.u32 %v3075_v51, %v3072_v57  ;;  %v1326_v8 = vrot.slane %v5771_v14, 1  ;;  %v3418_v58 = vsel %vm3391_vm6, %v3415_v54, %v3417_v19 }
 0x10e   :  { %v3422_v22 = vsel %vm3391_vm6, %v3419_v27, %v3421_v31  ;;  %v3424_v20 = vsel %vm3391_vm6, %v3421_v31, %v3423_v23 }
 0x10f   :  { %v3077_v42 = vsel %vm2916_vm5, %v3067_v59, %v3076_v30  ;;  %v1327_v21 = vsel %vm823_vm4, %v1324_v41, %v1326_v8 }
 0x112   :  { %5109 = vmatmul.mubr.msk.bf16.gmra.mrb[20].mxu1 %vm341_vm1, %v1315_v43  ;;  %v3068_v43 = vsel %vm2916_vm5, %v3058_v47, %v3067_v59  ;;  %v5775_v47 = vld [vmem:[%s7192_s3 + $0x8] sm:$0xff]  }
 0x113   :  { %5112 = vmatprep.mubr.msk.bf16.mxu1 %vm341_vm1, %v1317_v49  ;;  %v3084_v49 = vrot.slane %v3082_v61, 3  ;;  %5346 = vmatprep.subr.bf16.mxu1 %v5775_v47 }
 0x114   :  { %5285 = vmatmul.mubr.msk.bf16.gmra.mrb[20].mxu0 %vm341_vm1, %v3032_v39  ;;  %v3394_v39 = vsel %vm3391_vm6, %v3392_v33, %v3393_v55  ;;  %5347 = vmatpush3.bf16.msra.mxu1 %v5775_v47 }
 0x115   :  { %5288 = vmatprep.mubr.msk.bf16.mxu0 %vm341_vm1, %v3041_v25  ;;  %v3085_v12 = vor.u32 %v3084_v49, %v3081_v26  ;;  %v3400_v25 = vsel %vm3391_vm6, %v3397_v37, %v3399_v50  ;;  %5348 = vmatprep.subr.bf16.mxu1 %v5776_v62 }
 0x117   :  { %v3086_v35 = vsel %vm2916_vm5, %v3076_v30, %v3085_v12 }
 0x118   :  { %5349 = vmatpush3.bf16.msra.mxu1 %v5776_v62 }
 0x11a   :  { %5113 = vmatmul.mubr.msk.bf16.gmra.mrb[24].mxu1 %vm341_vm1, %v1319_v13  ;;  %v3406_v13 = vsel %vm3391_vm6, %v3403_v10, %v3405_v11 }
 0x11b   :  { %5116 = vmatprep.mubr.msk.bf16.mxu1 %vm341_vm1, %v1321_v24  ;;  %v3411_v24 = vrot.slane %v6517_v28, 3  ;;  %v3416_v28 = vsel %vm3391_vm6, %v3413_v46, %v3415_v54 }
 0x11c   :  { %5289 = vmatmul.mubr.msk.bf16.gmra.mrb[24].mxu0 %vm341_vm1, %v3050_v1  ;;  %v3425_v1 = vrot.slane %v6589_v6, 3  ;;  %v5777_v6 = vld [vmem:[%s7192_s3 + $0x18] sm:$0xff]  }
 0x11d   :  { %5292 = vmatprep.mubr.msk.bf16.mxu0 %vm341_vm1, %v3059_v34  ;;  %v3412_v53 = vsel %vm3391_vm6, %v3409_v60, %v3411_v24  ;;  %v3414_v18 = vsel %vm3391_vm6, %v3411_v24, %v3413_v46  ;;  %5350 = vmatprep.subr.bf16.mxu1 %v5777_v6 }
 0x11e   :  { %v3426_v56 = vsel %vm3391_vm6, %v3423_v23, %v3425_v1  ;;  %v3428_v16 = vsel %vm3391_vm6, %v3425_v1, %v3427_v7  ;;  %5351 = vmatpush3.bf16.msra.mxu1 %v5777_v6 }
 0x122   :  { %5117 = vmatmul.mubr.msk.bf16.gmra.mrb[28].mxu1 %vm341_vm1, %v1323_v36 }
 0x123   :  { %5120 = vmatprep.mubr.msk.bf16.mxu1 %vm341_vm1, %v1325_v2 }
 0x124   :  { %5293 = vmatmul.mubr.msk.bf16.gmra.mrb[28].mxu0 %vm341_vm1, %v3068_v43 }
 0x125   :  { %5296 = vmatprep.mubr.msk.bf16.mxu0 %vm341_vm1, %v3077_v42 }
 0x12a   :  { %5121 = vmatmul.mubr.msk.bf16.gmra.mrb[32].mxu1 %vm341_vm1, %v1327_v21 }
 0x12c   :  { %5297 = vmatmul.mubr.msk.bf16.gmra.mrb[32].mxu0 %vm341_vm1, %v3086_v35 }
 0x12d   :  { %5308 = vmatprep.mubr.msk.bf16.mxu0 %vm341_vm1, %v3394_v39 }
 0x134   :  { %5309 = vmatmul.mubr.msk.bf16.vlgmr.msra.gmra.mrb[0].mxu0 %vm341_vm1, %v3396_v40 }
 0x135   :  { %5312 = vmatprep.mubr.msk.bf16.mxu0 %vm341_vm1, %v3398_v5 }
 0x13c   :  { %5313 = vmatmul.mubr.msk.bf16.gmra.mrb[4].mxu0 %vm341_vm1, %v3400_v25 }
 0x13d   :  { %5316 = vmatprep.mubr.msk.bf16.mxu0 %vm341_vm1, %v3402_v45 }
 0x144   :  { %5317 = vmatmul.mubr.msk.bf16.gmra.mrb[8].mxu0 %vm341_vm1, %v3404_v52 }
 0x145   :  { %5320 = vmatprep.mubr.msk.bf16.mxu0 %vm341_vm1, %v3406_v13  ;;  %v6921_v13 = vld [vmem:[%s7193_s2] ss:$0 sm:$0xff] }
 0x14c   :  { %5321 = vmatmul.mubr.msk.bf16.gmra.mrb[12].mxu0 %vm341_vm1, %v3408_v3 }
 0x14d   :  { %5324 = vmatprep.mubr.msk.bf16.mxu0 %vm341_vm1, %v3410_v17 }
 0x154   :  { %5325 = vmatmul.mubr.msk.bf16.gmra.mrb[16].mxu0 %vm341_vm1, %v3412_v53 }
 0x155   :  { %5328 = vmatprep.mubr.msk.bf16.mxu0 %vm341_vm1, %v3414_v18 }
 0x15c   :  { %5329 = vmatmul.mubr.msk.bf16.gmra.mrb[20].mxu0 %vm341_vm1, %v3416_v28 }
 0x15d   :  { %5332 = vmatprep.mubr.msk.bf16.mxu0 %vm341_vm1, %v3418_v58 }
 0x164   :  { %5333 = vmatmul.mubr.msk.bf16.gmra.mrb[24].mxu0 %vm341_vm1, %v3420_v9 }
 0x165   :  { %5336 = vmatprep.mubr.msk.bf16.mxu0 %vm341_vm1, %v3422_v22 }
 0x16c   :  { %5337 = vmatmul.mubr.msk.bf16.gmra.mrb[28].mxu0 %vm341_vm1, %v3424_v20 }
 0x16d   :  { %5340 = vmatprep.mubr.msk.bf16.mxu0 %vm341_vm1, %v3426_v56 }
 0x174   :  { %5341 = vmatmul.mubr.msk.bf16.gmra.mrb[32].mxu0 %vm341_vm1, %v3428_v16 }
 0x1bd   :  { %v5090_v4 = vpop.f32.mrb[0].mxu1 }
 0x1be   :  { %v1440_v41 = vpop.f32.mrb[1].mxu1 }
 0x1bf   :  { %v5091_v34 = vpop.f32.mrb[2].mxu1 }
 0x1c0   :  { %v1443_v57 = vpop.f32.mrb[3].mxu1 }
 0x1c5   :  { %v5094_v51 = vpop.f32.mrb[4].mxu1 }
 0x1c6   :  { %v1456_v36 = vpop.f32.mrb[5].mxu1 }
 0x1c7   :  { %v5095_v14 = vpop.f32.mrb[6].mxu1 }
 0x1c8   :  { %v1459_v44 = vpop.f32.mrb[7].mxu1 }
 0x1cd   :  { %v6862_v59 = vpop.f32.mrb[8].mxu1 }
 0x1ce   :  { %v6864_v2 = vpop.f32.mrb[9].mxu1 }
 0x1cf   :  { %v6866_v15 = vpop.f32.mrb[10].mxu1 }
 0x1d0   :  { %v6868_v61 = vpop.f32.mrb[11].mxu1 }
 0x1d5   :  { %v6870_v30 = vpop.f32.mrb[12].mxu1 }
 0x1d6   :  { %v6872_v32 = vpop.f32.mrb[13].mxu1 }
 0x1d7   :  { %v6874_v8 = vpop.f32.mrb[14].mxu1 }
 0x1d8   :  { %v6876_v43 = vpop.f32.mrb[15].mxu1 }
 0x1dd   :  { %v6878_v26 = vpop.f32.mrb[16].mxu1 }
 0x1de   :  { %v6880_v49 = vpop.f32.mrb[17].mxu1 }
 0x1df   :  { %v6882_v42 = vpop.f32.mrb[18].mxu1 }
 0x1e0   :  { %v6884_v63 = vpop.f32.mrb[19].mxu1 }
 0x1e5   :  { %v6886_v21 = vpop.f32.mrb[20].mxu1 }
 0x1e6   :  { %v6888_v12 = vpop.f32.mrb[21].mxu1 }
 0x1e7   :  { %v6890_v33 = vpop.f32.mrb[22].mxu1 }
 0x1e8   :  { %v6892_v55 = vpop.f32.mrb[23].mxu1 }
 0x1ed   :  { %v6894_v35 = vpop.f32.mrb[24].mxu1 }
 0x1ee   :  { %v6896_v39 = vpop.f32.mrb[25].mxu1 }
 0x1ef   :  { %v6898_v38 = vpop.f32.mrb[26].mxu1 }
 0x1f0   :  { %v6900_v37 = vpop.f32.mrb[27].mxu1 }
 0x1f5   :  { %v6902_v40 = vpop.f32.mrb[28].mxu1 }
 0x1f6   :  { %v6904_v5 = vpop.f32.mrb[29].mxu1 }
 0x1f7   :  { %v6906_v50 = vpop.f32.mrb[30].mxu1 }
 0x1f8   :  { %v6908_v29 = vpop.f32.mrb[31].mxu1 }
 0x1fd   :  { %v6910_v25 = vpop.f32.mrb[32].mxu1 }
 0x1fe   :  { %v6912_v45 = vpop.f32.mrb[33].mxu1 }
 0x1ff   :  { %v6914_v10 = vpop.f32.mrb[34].mxu1 }
 0x200   :  { %v6916_v11 = vpop.f32.mrb[35].mxu1 }
 0x207   :  { %v5310_v52 = vpop.f32.mrb[0].mxu0 }
 0x208   :  { %v5388_v48 = vadd.f32 %v5310_v52, %v5090_v4  ;;  %v3541_v60 = vpop.f32.mrb[1].mxu0 }
 0x209   :  { %v5389_v0 = vadd.f32 %v3541_v60, %v1440_v41  ;;  %v5311_v3 = vpop.f32.mrb[2].mxu0 }
 0x20a   :  { %v3729_v17 = vadd.f32 %v5388_v48, %v6921_v13  ;;  %v5390_v24 = vadd.f32 %v5311_v3, %v5091_v34  ;;  %v3544_v46 = vpop.f32.mrb[3].mxu0 }
 0x20b   :  { %v3727_v53 = vadd.f32 %v5389_v0, %v6921_v13  ;;  %v5391_v18 = vadd.f32 %v3544_v46, %v1443_v57 }
 0x20c   :  { %v3730_v54 = vadd.f32 %v5390_v24, %v6921_v13  ;;  %v3765_v19 = vmax.f32 %v3729_v17, 0.0 }
 0x20d   :  { %v3728_v47 = vadd.f32 %v5391_v18, %v6921_v13  ;;  %v3763_v58 = vmax.f32 %v3727_v53, 0.0 }
 0x20e   :  { %v3766_v28 = vmax.f32 %v3730_v54, 0.0 }
 0x20f   :  { %v3764_v27 = vmax.f32 %v3728_v47, 0.0  ;;  %v5314_v31 = vpop.f32.mrb[4].mxu0 }
 0x210   :  { %v3800_v9 = vpack.c.bf16 %v3766_v28, %v3765_v19  ;;  %v5392_v22 = vadd.f32 %v5314_v31, %v5094_v51  ;;  %v3557_v23 = vpop.f32.mrb[5].mxu0 }
 0x211   :  { %v3799_v1 = vpack.c.bf16 %v3764_v27, %v3763_v58  ;;  %v5393_v20 = vadd.f32 %v3557_v23, %v1456_v36  ;;  %v5315_v56 = vpop.f32.mrb[6].mxu0 }
 0x212   :  { %v3733_v62 = vadd.f32 %v5392_v22, %v6921_v13  ;;  %v5394_v7 = vadd.f32 %v5315_v56, %v5095_v14  ;;  %v3560_v16 = vpop.f32.mrb[7].mxu0 }
 0x213   :  { %v3731_v6 = vadd.f32 %v5393_v20, %v6921_v13  ;;  %v5395_v4 = vadd.f32 %v3560_v16, %v1459_v44  ;;  %5352 = vmatprep.mubr.msk.bf16.mxu1 %vm341_vm1, %v3799_v1 }
 0x214   :  { %v3734_v41 = vadd.f32 %v5394_v7, %v6921_v13  ;;  %5353 = vmatmul.mubr.msk.bf16.vlgmr.msra.gmra.mrb[36].mxu1 %vm341_vm1, %v3800_v9  ;;  %v3769_v57 = vmax.f32 %v3733_v62, 0.0 }
 0x215   :  { %v3732_v34 = vadd.f32 %v5395_v4, %v6921_v13  ;;  %v3767_v52 = vmax.f32 %v3731_v6, 0.0 }
 0x216   :  { %v3770_v51 = vmax.f32 %v3734_v41, 0.0 }
 0x217   :  { %v3768_v36 = vmax.f32 %v3732_v34, 0.0  ;;  %v5318_v48 = vpop.f32.mrb[8].mxu0 }
 0x218   :  { %v3802_v60 = vpack.c.bf16 %v3770_v51, %v3769_v57  ;;  %v5396_v14 = vadd.f32 %v5318_v48, %v6862_v59  ;;  %v3573_v0 = vpop.f32.mrb[9].mxu0 }
 0x219   :  { %v3801_v3 = vpack.c.bf16 %v3768_v36, %v3767_v52  ;;  %v5397_v44 = vadd.f32 %v3573_v0, %v6864_v2  ;;  %v5319_v17 = vpop.f32.mrb[10].mxu0 }
 0x21a   :  { %v3737_v24 = vadd.f32 %v5396_v14, %v6921_v13  ;;  %v5398_v46 = vadd.f32 %v5319_v17, %v6866_v15  ;;  %v3576_v53 = vpop.f32.mrb[11].mxu0 }
 0x21b   :  { %v3735_v18 = vadd.f32 %v5397_v44, %v6921_v13  ;;  %v5399_v54 = vadd.f32 %v3576_v53, %v6868_v61  ;;  %5356 = vmatprep.mubr.msk.bf16.mxu1 %vm341_vm1, %v3801_v3 }
 0x21c   :  { %v3738_v47 = vadd.f32 %v5398_v46, %v6921_v13  ;;  %5357 = vmatmul.mubr.msk.bf16.gmra.mrb[40].mxu1 %vm341_vm1, %v3802_v60  ;;  %v3773_v19 = vmax.f32 %v3737_v24, 0.0 }
 0x21d   :  { %v3736_v59 = vadd.f32 %v5399_v54, %v6921_v13  ;;  %v3771_v28 = vmax.f32 %v3735_v18, 0.0 }
 0x21e   :  { %v3774_v2 = vmax.f32 %v3738_v47, 0.0 }
 0x21f   :  { %v3772_v58 = vmax.f32 %v3736_v59, 0.0  ;;  %v5322_v27 = vpop.f32.mrb[12].mxu0 }
 0x220   :  { %v3804_v31 = vpack.c.bf16 %v3774_v2, %v3773_v19  ;;  %v5400_v15 = vadd.f32 %v5322_v27, %v6870_v30  ;;  %v3589_v9 = vpop.f32.mrb[13].mxu0 }
 0x221   :  { %v3803_v22 = vpack.c.bf16 %v3772_v58, %v3771_v28  ;;  %v5401_v61 = vadd.f32 %v3589_v9, %v6872_v32  ;;  %v5323_v23 = vpop.f32.mrb[14].mxu0 }
 0x222   :  { %v3741_v1 = vadd.f32 %v5400_v15, %v6921_v13  ;;  %v5402_v20 = vadd.f32 %v5323_v23, %v6874_v8  ;;  %v3592_v56 = vpop.f32.mrb[15].mxu0 }
 0x223   :  { %v3739_v62 = vadd.f32 %v5401_v61, %v6921_v13  ;;  %v5403_v7 = vadd.f32 %v3592_v56, %v6876_v43  ;;  %5360 = vmatprep.mubr.msk.bf16.mxu1 %vm341_vm1, %v3803_v22 }
 0x224   :  { %v3742_v16 = vadd.f32 %v5402_v20, %v6921_v13  ;;  %5361 = vmatmul.mubr.msk.bf16.gmra.mrb[44].mxu1 %vm341_vm1, %v3804_v31  ;;  %v3777_v6 = vmax.f32 %v3741_v1, 0.0 }
 0x225   :  { %v3740_v30 = vadd.f32 %v5403_v7, %v6921_v13  ;;  %v3775_v4 = vmax.f32 %v3739_v62, 0.0 }
 0x226   :  { %v3778_v32 = vmax.f32 %v3742_v16, 0.0 }
 0x227   :  { %v3776_v41 = vmax.f32 %v3740_v30, 0.0  ;;  %v5326_v34 = vpop.f32.mrb[16].mxu0 }
 0x228   :  { %v3806_v57 = vpack.c.bf16 %v3778_v32, %v3777_v6  ;;  %v5404_v8 = vadd.f32 %v5326_v34, %v6878_v26  ;;  %v3605_v51 = vpop.f32.mrb[17].mxu0 }
 0x229   :  { %v3805_v52 = vpack.c.bf16 %v3776_v41, %v3775_v4  ;;  %v5405_v43 = vadd.f32 %v3605_v51, %v6880_v49  ;;  %v5327_v36 = vpop.f32.mrb[18].mxu0 }
 0x22a   :  { %v3745_v48 = vadd.f32 %v5404_v8, %v6921_v13  ;;  %v5406_v60 = vadd.f32 %v5327_v36, %v6882_v42  ;;  %v3608_v14 = vpop.f32.mrb[19].mxu0 }
 0x22b   :  { %v3743_v0 = vadd.f32 %v5405_v43, %v6921_v13  ;;  %v5407_v3 = vadd.f32 %v3608_v14, %v6884_v63  ;;  %5364 = vmatprep.mubr.msk.bf16.mxu1 %vm341_vm1, %v3805_v52 }
 0x22c   :  { %v3746_v44 = vadd.f32 %v5406_v60, %v6921_v13  ;;  %5365 = vmatmul.mubr.msk.bf16.gmra.mrb[48].mxu1 %vm341_vm1, %v3806_v57  ;;  %v3781_v17 = vmax.f32 %v3745_v48, 0.0 }
 0x22d   :  { %v3744_v26 = vadd.f32 %v5407_v3, %v6921_v13  ;;  %v3779_v24 = vmax.f32 %v3743_v0, 0.0 }
 0x22e   :  { %v3782_v49 = vmax.f32 %v3746_v44, 0.0 }
 0x22f   :  { %v3780_v46 = vmax.f32 %v3744_v26, 0.0  ;;  %v5330_v53 = vpop.f32.mrb[20].mxu0 }
 0x230   :  { %v3808_v18 = vpack.c.bf16 %v3782_v49, %v3781_v17  ;;  %v5408_v42 = vadd.f32 %v5330_v53, %v6886_v21  ;;  %v3621_v54 = vpop.f32.mrb[21].mxu0 }
 0x231   :  { %v3807_v47 = vpack.c.bf16 %v3780_v46, %v3779_v24  ;;  %v5409_v63 = vadd.f32 %v3621_v54, %v6888_v12  ;;  %v5331_v59 = vpop.f32.mrb[22].mxu0 }
 0x232   :  { %v3749_v19 = vadd.f32 %v5408_v42, %v6921_v13  ;;  %v5410_v2 = vadd.f32 %v5331_v59, %v6890_v33  ;;  %v3624_v28 = vpop.f32.mrb[23].mxu0 }
 0x233   :  { %v3747_v58 = vadd.f32 %v5409_v63, %v6921_v13  ;;  %v5411_v27 = vadd.f32 %v3624_v28, %v6892_v55  ;;  %5368 = vmatprep.mubr.msk.bf16.mxu1 %vm341_vm1, %v3807_v47 }
 0x234   :  { %v3750_v31 = vadd.f32 %v5410_v2, %v6921_v13  ;;  %5369 = vmatmul.mubr.msk.bf16.gmra.mrb[52].mxu1 %vm341_vm1, %v3808_v18  ;;  %v3785_v15 = vmax.f32 %v3749_v19, 0.0 }
 0x235   :  { %v3748_v21 = vadd.f32 %v5411_v27, %v6921_v13  ;;  %v3783_v9 = vmax.f32 %v3747_v58, 0.0 }
 0x236   :  { %v3786_v12 = vmax.f32 %v3750_v31, 0.0 }
 0x237   :  { %v3784_v22 = vmax.f32 %v3748_v21, 0.0  ;;  %v5334_v61 = vpop.f32.mrb[24].mxu0 }
 0x238   :  { %v3810_v23 = vpack.c.bf16 %v3786_v12, %v3785_v15  ;;  %v5412_v33 = vadd.f32 %v5334_v61, %v6894_v35  ;;  %v3637_v1 = vpop.f32.mrb[25].mxu0 }
 0x239   :  { %v3809_v20 = vpack.c.bf16 %v3784_v22, %v3783_v9  ;;  %v5413_v55 = vadd.f32 %v3637_v1, %v6896_v39  ;;  %v5335_v56 = vpop.f32.mrb[26].mxu0 }
 0x23a   :  { %v3753_v62 = vadd.f32 %v5412_v33, %v6921_v13  ;;  %v5414_v7 = vadd.f32 %v5335_v56, %v6898_v38  ;;  %v3640_v16 = vpop.f32.mrb[27].mxu0 }
 0x23b   :  { %v3751_v30 = vadd.f32 %v5413_v55, %v6921_v13  ;;  %v5415_v6 = vadd.f32 %v3640_v16, %v6900_v37  ;;  %5372 = vmatprep.mubr.msk.bf16.mxu1 %vm341_vm1, %v3809_v20 }
 0x23c   :  { %v3754_v32 = vadd.f32 %v5414_v7, %v6921_v13  ;;  %5373 = vmatmul.mubr.msk.bf16.gmra.mrb[56].mxu1 %vm341_vm1, %v3810_v23  ;;  %v3789_v4 = vmax.f32 %v3753_v62, 0.0 }
 0x23d   :  { %v3752_v35 = vadd.f32 %v5415_v6, %v6921_v13  ;;  %v3787_v41 = vmax.f32 %v3751_v30, 0.0 }
 0x23e   :  { %v3790_v39 = vmax.f32 %v3754_v32, 0.0 }
 0x23f   :  { %v3788_v34 = vmax.f32 %v3752_v35, 0.0  ;;  %v5338_v57 = vpop.f32.mrb[28].mxu0 }
 0x240   :  { %v3812_v8 = vpack.c.bf16 %v3790_v39, %v3789_v4  ;;  %v5416_v38 = vadd.f32 %v5338_v57, %v6902_v40  ;;  %v3653_v51 = vpop.f32.mrb[29].mxu0 }
 0x241   :  { %v3811_v52 = vpack.c.bf16 %v3788_v34, %v3787_v41  ;;  %v5417_v37 = vadd.f32 %v3653_v51, %v6904_v5  ;;  %v5339_v43 = vpop.f32.mrb[30].mxu0 }
 0x242   :  { %v3757_v36 = vadd.f32 %v5416_v38, %v6921_v13  ;;  %v5418_v48 = vadd.f32 %v5339_v43, %v6906_v50  ;;  %v3656_v60 = vpop.f32.mrb[31].mxu0 }
 0x243   :  { %v3755_v14 = vadd.f32 %v5417_v37, %v6921_v13  ;;  %v5419_v0 = vadd.f32 %v3656_v60, %v6908_v29  ;;  %5376 = vmatprep.mubr.msk.bf16.mxu1 %vm341_vm1, %v3811_v52 }
 0x244   :  { %v3758_v3 = vadd.f32 %v5418_v48, %v6921_v13  ;;  %5377 = vmatmul.mubr.msk.bf16.gmra.mrb[60].mxu1 %vm341_vm1, %v3812_v8  ;;  %v3793_v44 = vmax.f32 %v3757_v36, 0.0 }
 0x245   :  { %v3756_v40 = vadd.f32 %v5419_v0, %v6921_v13  ;;  %v3791_v26 = vmax.f32 %v3755_v14, 0.0 }
 0x246   :  { %v3794_v5 = vmax.f32 %v3758_v3, 0.0 }
 0x247   :  { %v3792_v17 = vmax.f32 %v3756_v40, 0.0  ;;  %v5342_v49 = vpop.f32.mrb[32].mxu0 }
 0x248   :  { %v3814_v24 = vpack.c.bf16 %v3794_v5, %v3793_v44  ;;  %v5420_v50 = vadd.f32 %v5342_v49, %v6910_v25  ;;  %v3669_v46 = vpop.f32.mrb[33].mxu0 }
 0x249   :  { %v3813_v53 = vpack.c.bf16 %v3792_v17, %v3791_v26  ;;  %v5421_v29 = vadd.f32 %v3669_v46, %v6912_v45  ;;  %v5343_v18 = vpop.f32.mrb[34].mxu0 }
 0x24a   :  { %v3761_v42 = vadd.f32 %v5420_v50, %v6921_v13  ;;  %v5422_v54 = vadd.f32 %v5343_v18, %v6914_v10  ;;  %v3672_v47 = vpop.f32.mrb[35].mxu0  ;;  %v7008_v10 = vld [vmem:[%s7194_s4] ss:$0 sm:$0xff] }
 0x24b   :  { %v3759_v63 = vadd.f32 %v5421_v29, %v6921_v13  ;;  %v5423_v59 = vadd.f32 %v3672_v47, %v6916_v11  ;;  %5380 = vmatprep.mubr.msk.bf16.mxu1 %vm341_vm1, %v3813_v53 }
 0x24c   :  { %v3762_v19 = vadd.f32 %v5422_v54, %v6921_v13  ;;  %5381 = vmatmul.mubr.msk.bf16.gmra.mrb[64].mxu1 %vm341_vm1, %v3814_v24  ;;  %v3797_v2 = vmax.f32 %v3761_v42, 0.0 }
 0x24d   :  { %v3760_v25 = vadd.f32 %v5423_v59, %v6921_v13  ;;  %v3795_v28 = vmax.f32 %v3759_v63, 0.0 }
 0x24e   :  { %v3798_v45 = vmax.f32 %v3762_v19, 0.0 }
 0x24f   :  { %v3796_v58 = vmax.f32 %v3760_v25, 0.0 }
 0x250   :  { %v3816_v27 = vpack.c.bf16 %v3798_v45, %v3797_v2 }
 0x251   :  { %v3815_v31 = vpack.c.bf16 %v3796_v58, %v3795_v28 }
 0x253   :  { %5384 = vmatprep.mubr.msk.bf16.mxu1 %vm341_vm1, %v3815_v31 }
 0x254   :  { %5385 = vmatmul.mubr.msk.bf16.gmra.mrb[68].mxu1 %vm341_vm1, %v3816_v27 }
 0x2e7   :  { %v5354_v11 = vpop.f32.mrb[36].mxu1 }
 0x2e8   :  { %v3953_v21 = vadd.f32 %v5354_v11, %v7008_v10  ;;  %v3944_v15 = vpop.f32.mrb[37].mxu1 }
 0x2e9   :  { %v3945_v13 = vadd.f32 %v7008_v10, %v3944_v15  ;;  %v5355_v12 = vpop.f32.mrb[38].mxu1 }
 0x2ea   :  { %v4089_v9 = vmax.f32 %v3953_v21, 0.0  ;;  %v3956_v22 = vadd.f32 %v5355_v12, %v7008_v10  ;;  %v3947_v61 = vpop.f32.mrb[39].mxu1 }
 0x2eb   :  { %v4087_v23 = vmax.f32 %v3945_v13, 0.0  ;;  %v3948_v33 = vadd.f32 %v7008_v10, %v3947_v61 }
 0x2ec   :  { %v4694_v1 = vpack.c.bf16 %v4089_v9, %v4089_v9  ;;  %v4090_v20 = vmax.f32 %v3956_v22, 0.0 }
 0x2ed   :  { %v4692_v55 = vpack.c.bf16 %v4087_v23, %v4087_v23  ;;  %v4088_v56 = vmax.f32 %v3948_v33, 0.0 }
 0x2ee   :  { %4270 = vst.msk [vmem:[%s7195_s5 + $0x8] sm:$0xf] %vm4267_vm7, %v4694_v1  ;;  %v4695_v62 = vpack.c.bf16 %v4090_v20, %v4090_v20 }
 0x2ef   :  { %4268 = vst.msk [vmem:[%s7195_s5] sm:$0xf] %vm4267_vm7, %v4692_v55  ;;  %v4693_v7 = vpack.c.bf16 %v4088_v56, %v4088_v56  ;;  %v5358_v16 = vpop.f32.mrb[40].mxu1 }
 0x2f0   :  { %4271 = vst.msk [vmem:[%s7195_s5 + $0xc] sm:$0xf] %vm4267_vm7, %v4695_v62  ;;  %v3969_v30 = vadd.f32 %v5358_v16, %v7008_v10  ;;  %v3960_v6 = vpop.f32.mrb[41].mxu1 }
 0x2f1   :  { %4269 = vst.msk [vmem:[%s7195_s5 + $0x4] sm:$0xf] %vm4267_vm7, %v4693_v7  ;;  %v3961_v32 = vadd.f32 %v7008_v10, %v3960_v6  ;;  %v5359_v35 = vpop.f32.mrb[42].mxu1 }
 0x2f2   :  { %v4093_v4 = vmax.f32 %v3969_v30, 0.0  ;;  %v3972_v39 = vadd.f32 %v5359_v35, %v7008_v10  ;;  %v3963_v41 = vpop.f32.mrb[43].mxu1 }
 0x2f3   :  { %v4091_v34 = vmax.f32 %v3961_v32, 0.0  ;;  %v3964_v57 = vadd.f32 %v7008_v10, %v3963_v41 }
 0x2f4   :  { %v4698_v8 = vpack.c.bf16 %v4093_v4, %v4093_v4  ;;  %v4094_v38 = vmax.f32 %v3972_v39, 0.0 }
 0x2f5   :  { %v4696_v51 = vpack.c.bf16 %v4091_v34, %v4091_v34  ;;  %v4092_v52 = vmax.f32 %v3964_v57, 0.0 }
 0x2f6   :  { %4274 = vst.msk [vmem:[%s7195_s5 + $0x18] sm:$0xf] %vm4267_vm7, %v4698_v8  ;;  %v4699_v37 = vpack.c.bf16 %v4094_v38, %v4094_v38 }
 0x2f7   :  { %4272 = vst.msk [vmem:[%s7195_s5 + $0x10] sm:$0xf] %vm4267_vm7, %v4696_v51  ;;  %v4697_v43 = vpack.c.bf16 %v4092_v52, %v4092_v52  ;;  %v5362_v36 = vpop.f32.mrb[44].mxu1 }
 0x2f8   :  { %4275 = vst.msk [vmem:[%s7195_s5 + $0x1c] sm:$0xf] %vm4267_vm7, %v4699_v37  ;;  %v3985_v48 = vadd.f32 %v5362_v36, %v7008_v10  ;;  %v3976_v60 = vpop.f32.mrb[45].mxu1 }
 0x2f9   :  { %4273 = vst.msk [vmem:[%s7195_s5 + $0x14] sm:$0xf] %vm4267_vm7, %v4697_v43  ;;  %v3977_v14 = vadd.f32 %v7008_v10, %v3976_v60  ;;  %v5363_v0 = vpop.f32.mrb[46].mxu1 }
 0x2fa   :  { %v4097_v3 = vmax.f32 %v3985_v48, 0.0  ;;  %v3988_v40 = vadd.f32 %v5363_v0, %v7008_v10  ;;  %v3979_v44 = vpop.f32.mrb[47].mxu1 }
 0x2fb   :  { %v4095_v5 = vmax.f32 %v3977_v14, 0.0  ;;  %v3980_v26 = vadd.f32 %v7008_v10, %v3979_v44 }
 0x2fc   :  { %v4702_v17 = vpack.c.bf16 %v4097_v3, %v4097_v3  ;;  %v4098_v49 = vmax.f32 %v3988_v40, 0.0 }
 0x2fd   :  { %v4700_v24 = vpack.c.bf16 %v4095_v5, %v4095_v5  ;;  %v4096_v50 = vmax.f32 %v3980_v26, 0.0 }
 0x2fe   :  { %4278 = vst.msk [vmem:[%s7195_s5 + $0x28] sm:$0xf] %vm4267_vm7, %v4702_v17  ;;  %v4703_v46 = vpack.c.bf16 %v4098_v49, %v4098_v49 }
 0x2ff   :  { %4276 = vst.msk [vmem:[%s7195_s5 + $0x20] sm:$0xf] %vm4267_vm7, %v4700_v24  ;;  %v4701_v53 = vpack.c.bf16 %v4096_v50, %v4096_v50  ;;  %v5366_v29 = vpop.f32.mrb[48].mxu1 }
 0x300   :  { %4279 = vst.msk [vmem:[%s7195_s5 + $0x2c] sm:$0xf] %vm4267_vm7, %v4703_v46  ;;  %v4001_v18 = vadd.f32 %v5366_v29, %v7008_v10  ;;  %v3992_v42 = vpop.f32.mrb[49].mxu1 }
 0x301   :  { %4277 = vst.msk [vmem:[%s7195_s5 + $0x24] sm:$0xf] %vm4267_vm7, %v4701_v53  ;;  %v3993_v54 = vadd.f32 %v7008_v10, %v3992_v42  ;;  %v5367_v47 = vpop.f32.mrb[50].mxu1 }
 0x302   :  { %v4101_v63 = vmax.f32 %v4001_v18, 0.0  ;;  %v4004_v59 = vadd.f32 %v5367_v47, %v7008_v10  ;;  %v3995_v19 = vpop.f32.mrb[51].mxu1 }
 0x303   :  { %v4099_v25 = vmax.f32 %v3993_v54, 0.0  ;;  %v3996_v2 = vadd.f32 %v7008_v10, %v3995_v19 }
 0x304   :  { %v4706_v45 = vpack.c.bf16 %v4101_v63, %v4101_v63  ;;  %v4102_v28 = vmax.f32 %v4004_v59, 0.0 }
 0x305   :  { %v4704_v58 = vpack.c.bf16 %v4099_v25, %v4099_v25  ;;  %v4100_v27 = vmax.f32 %v3996_v2, 0.0 }
 0x306   :  { %4282 = vst.msk [vmem:[%s7195_s5 + $0x38] sm:$0xf] %vm4267_vm7, %v4706_v45  ;;  %v4707_v31 = vpack.c.bf16 %v4102_v28, %v4102_v28 }
 0x307   :  { %4280 = vst.msk [vmem:[%s7195_s5 + $0x30] sm:$0xf] %vm4267_vm7, %v4704_v58  ;;  %v4705_v11 = vpack.c.bf16 %v4100_v27, %v4100_v27  ;;  %v5370_v21 = vpop.f32.mrb[52].mxu1 }
 0x308   :  { %4283 = vst.msk [vmem:[%s7195_s5 + $0x3c] sm:$0xf] %vm4267_vm7, %v4707_v31  ;;  %v4017_v15 = vadd.f32 %v5370_v21, %v7008_v10  ;;  %v4008_v13 = vpop.f32.mrb[53].mxu1 }
 0x309   :  { %4281 = vst.msk [vmem:[%s7195_s5 + $0x34] sm:$0xf] %vm4267_vm7, %v4705_v11  ;;  %v4009_v12 = vadd.f32 %v7008_v10, %v4008_v13  ;;  %v5371_v9 = vpop.f32.mrb[54].mxu1 }
 0x30a   :  { %v4105_v22 = vmax.f32 %v4017_v15, 0.0  ;;  %v4020_v61 = vadd.f32 %v5371_v9, %v7008_v10  ;;  %v4011_v23 = vpop.f32.mrb[55].mxu1 }
 0x30b   :  { %v4103_v33 = vmax.f32 %v4009_v12, 0.0  ;;  %v4012_v1 = vadd.f32 %v7008_v10, %v4011_v23 }
 0x30c   :  { %v4710_v20 = vpack.c.bf16 %v4105_v22, %v4105_v22  ;;  %v4106_v55 = vmax.f32 %v4020_v61, 0.0 }
 0x30d   :  { %v4708_v56 = vpack.c.bf16 %v4103_v33, %v4103_v33  ;;  %v4104_v62 = vmax.f32 %v4012_v1, 0.0 }
 0x30e   :  { %4286 = vst.msk [vmem:[%s7195_s5 + $0x48] sm:$0xf] %vm4267_vm7, %v4710_v20  ;;  %v4711_v7 = vpack.c.bf16 %v4106_v55, %v4106_v55 }
 0x30f   :  { %4284 = vst.msk [vmem:[%s7195_s5 + $0x40] sm:$0xf] %vm4267_vm7, %v4708_v56  ;;  %v4709_v16 = vpack.c.bf16 %v4104_v62, %v4104_v62  ;;  %v5374_v30 = vpop.f32.mrb[56].mxu1 }
 0x310   :  { %4287 = vst.msk [vmem:[%s7195_s5 + $0x4c] sm:$0xf] %vm4267_vm7, %v4711_v7  ;;  %v4033_v6 = vadd.f32 %v5374_v30, %v7008_v10  ;;  %v4024_v32 = vpop.f32.mrb[57].mxu1 }
 0x311   :  { %4285 = vst.msk [vmem:[%s7195_s5 + $0x44] sm:$0xf] %vm4267_vm7, %v4709_v16  ;;  %v4025_v35 = vadd.f32 %v7008_v10, %v4024_v32  ;;  %v5375_v4 = vpop.f32.mrb[58].mxu1 }
 0x312   :  { %v4109_v39 = vmax.f32 %v4033_v6, 0.0  ;;  %v4036_v41 = vadd.f32 %v5375_v4, %v7008_v10  ;;  %v4027_v34 = vpop.f32.mrb[59].mxu1 }
 0x313   :  { %v4107_v57 = vmax.f32 %v4025_v35, 0.0  ;;  %v4028_v8 = vadd.f32 %v7008_v10, %v4027_v34 }
 0x314   :  { %v4714_v38 = vpack.c.bf16 %v4109_v39, %v4109_v39  ;;  %v4110_v51 = vmax.f32 %v4036_v41, 0.0 }
 0x315   :  { %v4712_v52 = vpack.c.bf16 %v4107_v57, %v4107_v57  ;;  %v4108_v37 = vmax.f32 %v4028_v8, 0.0 }
 0x316   :  { %4290 = vst.msk [vmem:[%s7195_s5 + $0x58] sm:$0xf] %vm4267_vm7, %v4714_v38  ;;  %v4715_v43 = vpack.c.bf16 %v4110_v51, %v4110_v51 }
 0x317   :  { %4288 = vst.msk [vmem:[%s7195_s5 + $0x50] sm:$0xf] %vm4267_vm7, %v4712_v52  ;;  %v4713_v36 = vpack.c.bf16 %v4108_v37, %v4108_v37  ;;  %v5378_v48 = vpop.f32.mrb[60].mxu1 }
 0x318   :  { %4291 = vst.msk [vmem:[%s7195_s5 + $0x5c] sm:$0xf] %vm4267_vm7, %v4715_v43  ;;  %v4049_v60 = vadd.f32 %v5378_v48, %v7008_v10  ;;  %v4040_v14 = vpop.f32.mrb[61].mxu1 }
 0x319   :  { %4289 = vst.msk [vmem:[%s7195_s5 + $0x54] sm:$0xf] %vm4267_vm7, %v4713_v36  ;;  %v4041_v0 = vadd.f32 %v7008_v10, %v4040_v14  ;;  %v5379_v3 = vpop.f32.mrb[62].mxu1 }
 0x31a   :  { %v4113_v40 = vmax.f32 %v4049_v60, 0.0  ;;  %v4052_v44 = vadd.f32 %v5379_v3, %v7008_v10  ;;  %v4043_v5 = vpop.f32.mrb[63].mxu1 }
 0x31b   :  { %v4111_v26 = vmax.f32 %v4041_v0, 0.0  ;;  %v4044_v17 = vadd.f32 %v7008_v10, %v4043_v5 }
 0x31c   :  { %v4718_v49 = vpack.c.bf16 %v4113_v40, %v4113_v40  ;;  %v4114_v24 = vmax.f32 %v4052_v44, 0.0 }
 0x31d   :  { %v4716_v50 = vpack.c.bf16 %v4111_v26, %v4111_v26  ;;  %v4112_v46 = vmax.f32 %v4044_v17, 0.0 }
 0x31e   :  { %4294 = vst.msk [vmem:[%s7195_s5 + $0x68] sm:$0xf] %vm4267_vm7, %v4718_v49  ;;  %v4719_v53 = vpack.c.bf16 %v4114_v24, %v4114_v24 }
 0x31f   :  { %4292 = vst.msk [vmem:[%s7195_s5 + $0x60] sm:$0xf] %vm4267_vm7, %v4716_v50  ;;  %v4717_v29 = vpack.c.bf16 %v4112_v46, %v4112_v46  ;;  %v5382_v18 = vpop.f32.mrb[64].mxu1 }
 0x320   :  { %4295 = vst.msk [vmem:[%s7195_s5 + $0x6c] sm:$0xf] %vm4267_vm7, %v4719_v53  ;;  %v4065_v42 = vadd.f32 %v5382_v18, %v7008_v10  ;;  %v4056_v54 = vpop.f32.mrb[65].mxu1 }
 0x321   :  { %4293 = vst.msk [vmem:[%s7195_s5 + $0x64] sm:$0xf] %vm4267_vm7, %v4717_v29  ;;  %v4057_v47 = vadd.f32 %v7008_v10, %v4056_v54  ;;  %v5383_v63 = vpop.f32.mrb[66].mxu1 }
 0x322   :  { %v4117_v59 = vmax.f32 %v4065_v42, 0.0  ;;  %v4068_v19 = vadd.f32 %v5383_v63, %v7008_v10  ;;  %v4059_v25 = vpop.f32.mrb[67].mxu1 }
 0x323   :  { %v4115_v2 = vmax.f32 %v4057_v47, 0.0  ;;  %v4060_v45 = vadd.f32 %v7008_v10, %v4059_v25 }
 0x324   :  { %v4722_v28 = vpack.c.bf16 %v4117_v59, %v4117_v59  ;;  %v4118_v58 = vmax.f32 %v4068_v19, 0.0 }
 0x325   :  { %v4720_v27 = vpack.c.bf16 %v4115_v2, %v4115_v2  ;;  %v4116_v31 = vmax.f32 %v4060_v45, 0.0 }
 0x326   :  { %4298 = vst.msk [vmem:[%s7195_s5 + $0x78] sm:$0xf] %vm4267_vm7, %v4722_v28  ;;  %v4723_v11 = vpack.c.bf16 %v4118_v58, %v4118_v58 }
 0x327   :  { %4296 = vst.msk [vmem:[%s7195_s5 + $0x70] sm:$0xf] %vm4267_vm7, %v4720_v27  ;;  %v4721_v21 = vpack.c.bf16 %v4116_v31, %v4116_v31  ;;  %v5386_v15 = vpop.f32.mrb[68].mxu1 }
 0x328   :  { %4299 = vst.msk [vmem:[%s7195_s5 + $0x7c] sm:$0xf] %vm4267_vm7, %v4723_v11  ;;  %v4081_v13 = vadd.f32 %v5386_v15, %v7008_v10  ;;  %v4072_v12 = vpop.f32.mrb[69].mxu1 }
 0x329   :  { %4297 = vst.msk [vmem:[%s7195_s5 + $0x74] sm:$0xf] %vm4267_vm7, %v4721_v21  ;;  %v4073_v9 = vadd.f32 %v7008_v10, %v4072_v12  ;;  %v5387_v22 = vpop.f32.mrb[70].mxu1 }
 0x32a   :  { %v4121_v61 = vmax.f32 %v4081_v13, 0.0  ;;  %v4084_v23 = vadd.f32 %v5387_v22, %v7008_v10  ;;  %v4075_v33 = vpop.f32.mrb[71].mxu1 }
 0x32b   :  { %v4119_v1 = vmax.f32 %v4073_v9, 0.0  ;;  %v4076_v20 = vadd.f32 %v7008_v10, %v4075_v33 }
 0x32c   :  { %v4726_v55 = vpack.c.bf16 %v4121_v61, %v4121_v61  ;;  %v4122_v56 = vmax.f32 %v4084_v23, 0.0 }
 0x32d   :  { %v4724_v62 = vpack.c.bf16 %v4119_v1, %v4119_v1  ;;  %v4120_v7 = vmax.f32 %v4076_v20, 0.0 }
 0x32e   :  { %4302 = vst.msk [vmem:[%s7195_s5 + $0x88] sm:$0xf] %vm4267_vm7, %v4726_v55  ;;  %v4727_v16 = vpack.c.bf16 %v4122_v56, %v4122_v56 }
 0x32f   :  { %4300 = vst.msk [vmem:[%s7195_s5 + $0x80] sm:$0xf] %vm4267_vm7, %v4724_v62  ;;  %v4725_v30 = vpack.c.bf16 %v4120_v7, %v4120_v7 }
 0x330   :  { %4303 = vst.msk [vmem:[%s7195_s5 + $0x8c] sm:$0xf] %vm4267_vm7, %v4727_v16 }
 0x331   :  { %4301 = vst.msk [vmem:[%s7195_s5 + $0x84] sm:$0xf] %vm4267_vm7, %v4725_v30 }

</bundles_post_ra>
